<compile_context>
chip_gen: v5e
topology: v5e:2x2
jax: 0.10.0
libtpu: 0.0.40
codegen_flags: <defaults>
</compile_context>

<pallas_src>
import jax
import jax.numpy as jnp
from jax.experimental import pallas as pl
from jax.experimental.pallas import tpu as pltpu

OBS_DIM = 5
OBS_PAD = 8          # padded feature dim (sublane multiple)
HID = 512
HEAD_PAD = 128       # lane-dense fused head width (col 0 = mu, col 1 = log_std)


def _round_up(x, m):
    return (x + m - 1) // m * m


def _silu(x):
    # x * sigmoid(x), with sigmoid(x) = 0.5*(tanh(0.5*x)+1): single EUP op.
    return x * (0.5 * (jnp.tanh(0.5 * x) + 1.0))


# ----------------------------------------------------------------------------
# Kernel
# ----------------------------------------------------------------------------
def actor_kernel(x_ref, w1_ref, w2_ref, w3_ref, b123_ref, hw_ref, hb_ref, out_ref):
    # x tile: (TB, 8) already bf16; MXU matmuls accumulate in f32.
    x = x_ref[...]

    h = jnp.dot(x, w1_ref[...], preferred_element_type=jnp.float32)
    h = _silu(h + b123_ref[0:1, :])                                   # (TB, 512) f32

    h = jnp.dot(h.astype(jnp.bfloat16), w2_ref[...],
                preferred_element_type=jnp.float32)
    h = _silu(h + b123_ref[1:2, :])

    h = jnp.dot(h.astype(jnp.bfloat16), w3_ref[...],
                preferred_element_type=jnp.float32)
    h = _silu(h + b123_ref[2:3, :])

    # Fused heads: one lane-dense (TB, 128) matmul + unmasked store.
    y = jnp.dot(h.astype(jnp.bfloat16), hw_ref[...],
                preferred_element_type=jnp.float32) + hb_ref[...]

    lane = jax.lax.broadcasted_iota(jnp.int32, y.shape, dimension=1)
    std_all = jnp.exp(jnp.clip(y, -20.0, 2.0))        # cheap; only lane 1 kept
    out_ref[...] = jnp.where(lane == 1, std_all, y)   # col 0 = mu, col 1 = std


# ----------------------------------------------------------------------------
# Wrapper
# ----------------------------------------------------------------------------
def actor_forward(x, packed_params, *, tb=None):
    """x: (B, 5) float32.  packed_params: output of pack_params().

    Returns (mu, std), each (B, 1) float32."""
    w1, w2, w3, b123, hw, hb = packed_params
    B, F = x.shape
    assert F == OBS_DIM

    if tb is None:
        if B <= 256:
            # Single-step grid; 16-row rounding matches bf16 (16,128) packing.
            tb = _round_up(B, 16)
        else:
            # Keep M a multiple of 256 (fills v6e/v7x MXU) and guarantee >= 2
            # grid steps so the "parallel" axis shards across v7x's 2 TCs.
            tb = min(256, _round_up(-(-B // 2), 256))
    b_pad = _round_up(B, tb)
    assert b_pad % tb == 0, f"batch tile {tb} must divide padded batch {b_pad}"
    grid = (b_pad // tb,)

    # Pad observations: rows -> b_pad, features 5 -> 8 (zeros); pre-cast bf16.
    xp = jnp.zeros((b_pad, OBS_PAD), jnp.bfloat16)
    xp = xp.at[:B, :F].set(x.astype(jnp.bfloat16))

    flops = 2 * b_pad * (OBS_PAD * HID + 2 * HID * HID + HID * HEAD_PAD)
    transcendentals = b_pad * (3 * HID + HEAD_PAD)
    bytes_accessed = (
        (OBS_PAD * HID + 2 * HID * HID + HID * HEAD_PAD) * 2   # bf16 weights
        + (3 * HID + HEAD_PAD) * 4                              # f32 biases
        + b_pad * OBS_PAD * 2                                   # bf16 x
        + b_pad * HEAD_PAD * 4                                  # f32 out
    )

    pinned = dict(pipeline_mode=pl.Buffered(1))   # block index never changes

    out = pl.pallas_call(
        actor_kernel,
        out_shape=jax.ShapeDtypeStruct((b_pad, HEAD_PAD), jnp.float32),
        grid=grid,
        in_specs=[
            pl.BlockSpec((tb, OBS_PAD), lambda i: (i, 0)),                 # x tile
            pl.BlockSpec((OBS_PAD, HID), lambda i: (0, 0), **pinned),      # w1
            pl.BlockSpec((HID, HID), lambda i: (0, 0), **pinned),          # w2
            pl.BlockSpec((HID, HID), lambda i: (0, 0), **pinned),          # w3
            pl.BlockSpec((3, HID), lambda i: (0, 0), **pinned),            # biases
            pl.BlockSpec((HID, HEAD_PAD), lambda i: (0, 0), **pinned),     # head W
            pl.BlockSpec((1, HEAD_PAD), lambda i: (0, 0), **pinned),       # head b
        ],
        out_specs=pl.BlockSpec((tb, HEAD_PAD), lambda i: (i, 0)),
        compiler_params=pltpu.CompilerParams(
            dimension_semantics=("parallel",)),
        cost_estimate=pl.CostEstimate(
            flops=flops,
            transcendentals=transcendentals,
            bytes_accessed=bytes_accessed),
    )(xp, w1, w2, w3, b123, hw, hb)

    head = out[:B, :2]            # single slice of the lane-dense output
    mu = head[:, 0:1]
    std = head[:, 1:2]
    return mu, std


# ----------------------------------------------------------------------------
# Parameters
# ----------------------------------------------------------------------------
def init_params(key):
    """Deterministic synthetic parameters, shapes matching the PyTorch module.

    Weights are stored (in_features, out_features); biases as (1, out)."""
    sizes = [(OBS_DIM, HID), (HID, HID), (HID, HID), (HID, 1), (HID, 1)]
    keys = jax.random.split(key, 2 * len(sizes))
    params = []
    for i, (fan_in, fan_out) in enumerate(sizes):
        wk, bk = keys[2 * i], keys[2 * i + 1]
        bound = 1.0 / jnp.sqrt(fan_in)
        w = jax.random.uniform(wk, (fan_in, fan_out), jnp.float32, -bound, bound)
        b = jax.random.uniform(bk, (1, fan_out), jnp.float32, -bound, bound)
        params += [w, b]
    return tuple(params)


def pack_params(params):
    """Pack raw (PyTorch-layout) params into the kernel's fused layout."""
    w1, b1, w2, b2, w3, b3, wh1, bh1, wh2, bh2 = params

    # w1: pad K from 5 -> 8, cast hidden weights to bf16.
    w1p = jnp.zeros((OBS_PAD, HID), jnp.float32).at[:OBS_DIM, :].set(w1)
    w1p = w1p.astype(jnp.bfloat16)
    w2p = w2.astype(jnp.bfloat16)
    w3p = w3.astype(jnp.bfloat16)

    # Pack hidden biases into one (3, 512) f32 array.
    b123 = jnp.concatenate([b1, b2, b3], axis=0)                      # (3, 512)

    # Fuse heads: (512, 128) bf16 weight (col 0 = mu, col 1 = log_std),
    # (1, 128) f32 bias.
    hw = jnp.zeros((HID, HEAD_PAD), jnp.float32)
    hw = hw.at[:, 0:1].set(wh1).at[:, 1:2].set(wh2).astype(jnp.bfloat16)
    hb = jnp.zeros((1, HEAD_PAD), jnp.float32)
    hb = hb.at[:, 0:1].set(bh1).at[:, 1:2].set(bh2)

    return (w1p, w2p, w3p, b123, hw, hb)


# ----------------------------------------------------------------------------
# Pure-JAX reference (mirrors the kernel's bf16 weight / f32-accumulate math)
# ----------------------------------------------------------------------------
def actor_reference(x, packed_params):
    w1, w2, w3, b123, hw, hb = packed_params
    B = x.shape[0]
    xp = jnp.zeros((B, OBS_PAD), jnp.float32).at[:, :OBS_DIM].set(x)

    def bdot(a, w):
        return jnp.dot(a.astype(jnp.bfloat16), w,
                       preferred_element_type=jnp.float32)

    h = _silu(bdot(xp, w1) + b123[0:1, :])
    h = _silu(bdot(h, w2) + b123[1:2, :])
    h = _silu(bdot(h, w3) + b123[2:3, :])
    y = bdot(h, hw) + hb
    mu = y[:, 0:1]
    std = jnp.exp(jnp.clip(y[:, 1:2], -20.0, 2.0))
    return mu, std


if __name__ == "__main__":
    key = jax.random.PRNGKey(0)
    pkey, xkey = jax.random.split(key)
    raw_params = init_params(pkey)
    packed = pack_params(raw_params)

    B = 8
    x = jax.random.normal(xkey, (B, OBS_DIM), jnp.float32)   # observation dim = 5

    mu, std = actor_forward(x, packed)
    jax.block_until_ready((mu, std))

    mu_ref, std_ref = actor_reference(x, packed)
    assert mu.shape == (B, 1) and std.shape == (B, 1)
    assert jnp.allclose(mu, mu_ref, atol=2e-3, rtol=2e-3), (
        f"mu mismatch: max abs err {jnp.max(jnp.abs(mu - mu_ref))}")
    assert jnp.allclose(std, std_ref, atol=2e-3, rtol=2e-3), (
        f"std mismatch: max abs err {jnp.max(jnp.abs(std - std_ref))}")
    assert bool(jnp.all(std > 0.0))

    print("KERNEL_OK")
</pallas_src>

<mosaic_0001>
module attributes {stable_mosaic.version = 11 : i64} {
  func.func @actor_kernel(%arg0: i32, %arg1: memref<16x8xbf16, #tpu.memory_space<vmem>>, %arg2: memref<8x512xbf16, #tpu.memory_space<vmem>>, %arg3: memref<512x512xbf16, #tpu.memory_space<vmem>>, %arg4: memref<512x512xbf16, #tpu.memory_space<vmem>>, %arg5: memref<3x512xf32, #tpu.memory_space<vmem>>, %arg6: memref<512x128xbf16, #tpu.memory_space<vmem>>, %arg7: memref<1x128xf32, #tpu.memory_space<vmem>>, %arg8: memref<16x128xf32, #tpu.memory_space<vmem>>) attributes {dimension_semantics = [#tpu.dimension_semantics<parallel>], iteration_bounds = array<i64: 1>, scalar_prefetch = 0 : i64, scratch_operands = 0 : i64, tpu.core_type = #tpu.core_type<tc>, window_params = [{transform_indices = @transform_0, window_bounds = array<i64: 16, 8>}, {pipeline_mode = #tpu.pipeline_mode<synchronous>, transform_indices = @transform_1, window_bounds = array<i64: 8, 512>}, {pipeline_mode = #tpu.pipeline_mode<synchronous>, transform_indices = @transform_2, window_bounds = array<i64: 512, 512>}, {pipeline_mode = #tpu.pipeline_mode<synchronous>, transform_indices = @transform_3, window_bounds = array<i64: 512, 512>}, {pipeline_mode = #tpu.pipeline_mode<synchronous>, transform_indices = @transform_4, window_bounds = array<i64: 3, 512>}, {pipeline_mode = #tpu.pipeline_mode<synchronous>, transform_indices = @transform_5, window_bounds = array<i64: 512, 128>}, {pipeline_mode = #tpu.pipeline_mode<synchronous>, transform_indices = @transform_6, window_bounds = array<i64: 1, 128>}, {transform_indices = @transform_7, window_bounds = array<i64: 16, 128>}]} {
    %c0 = arith.constant 0 : index
    %c0_0 = arith.constant 0 : index
    %0 = vector.load %arg1[%c0, %c0_0] : memref<16x8xbf16, #tpu.memory_space<vmem>>, vector<16x8xbf16>
    %c0_1 = arith.constant 0 : index
    %c0_2 = arith.constant 0 : index
    %1 = vector.load %arg2[%c0_1, %c0_2] : memref<8x512xbf16, #tpu.memory_space<vmem>>, vector<8x512xbf16>
    %cst = arith.constant dense<0.000000e+00> : vector<16x512xf32>
    %2 = tpu.matmul %0, %1, %cst {dimension_numbers = #tpu.dot_dimension_numbers<[1], [0], [0], [1], [0, 0, 1, 1], [], []>} : vector<16x8xbf16>, vector<8x512xbf16>, vector<16x512xf32> -> vector<16x512xf32>
    %c0_3 = arith.constant 0 : index
    %c0_4 = arith.constant 0 : index
    %3 = vector.load %arg5[%c0_3, %c0_4] : memref<3x512xf32, #tpu.memory_space<vmem>>, vector<1x512xf32>
    %4 = vector.broadcast %3 : vector<1x512xf32> to vector<16x512xf32>
    %5 = arith.addf %2, %4 : vector<16x512xf32>
    %cst_5 = arith.constant 5.000000e-01 : f32
    %6 = vector.broadcast %cst_5 : f32 to vector<16x512xf32>
    %7 = arith.mulf %6, %5 : vector<16x512xf32>
    %8 = math.tanh %7 : vector<16x512xf32>
    %cst_6 = arith.constant 1.000000e+00 : f32
    %9 = vector.broadcast %cst_6 : f32 to vector<16x512xf32>
    %10 = arith.addf %8, %9 : vector<16x512xf32>
    %cst_7 = arith.constant 5.000000e-01 : f32
    %11 = vector.broadcast %cst_7 : f32 to vector<16x512xf32>
    %12 = arith.mulf %11, %10 : vector<16x512xf32>
    %13 = arith.mulf %5, %12 : vector<16x512xf32>
    %14 = arith.truncf %13 : vector<16x512xf32> to vector<16x512xbf16>
    %c0_8 = arith.constant 0 : index
    %c0_9 = arith.constant 0 : index
    %15 = vector.load %arg3[%c0_8, %c0_9] : memref<512x512xbf16, #tpu.memory_space<vmem>>, vector<512x512xbf16>
    %cst_10 = arith.constant dense<0.000000e+00> : vector<16x512xf32>
    %16 = tpu.matmul %14, %15, %cst_10 {dimension_numbers = #tpu.dot_dimension_numbers<[1], [0], [0], [1], [0, 0, 1, 1], [], []>} : vector<16x512xbf16>, vector<512x512xbf16>, vector<16x512xf32> -> vector<16x512xf32>
    %c1 = arith.constant 1 : index
    %c0_11 = arith.constant 0 : index
    %17 = vector.load %arg5[%c1, %c0_11] : memref<3x512xf32, #tpu.memory_space<vmem>>, vector<1x512xf32>
    %18 = vector.broadcast %17 : vector<1x512xf32> to vector<16x512xf32>
    %19 = arith.addf %16, %18 : vector<16x512xf32>
    %cst_12 = arith.constant 5.000000e-01 : f32
    %20 = vector.broadcast %cst_12 : f32 to vector<16x512xf32>
    %21 = arith.mulf %20, %19 : vector<16x512xf32>
    %22 = math.tanh %21 : vector<16x512xf32>
    %cst_13 = arith.constant 1.000000e+00 : f32
    %23 = vector.broadcast %cst_13 : f32 to vector<16x512xf32>
    %24 = arith.addf %22, %23 : vector<16x512xf32>
    %cst_14 = arith.constant 5.000000e-01 : f32
    %25 = vector.broadcast %cst_14 : f32 to vector<16x512xf32>
    %26 = arith.mulf %25, %24 : vector<16x512xf32>
    %27 = arith.mulf %19, %26 : vector<16x512xf32>
    %28 = arith.truncf %27 : vector<16x512xf32> to vector<16x512xbf16>
    %c0_15 = arith.constant 0 : index
    %c0_16 = arith.constant 0 : index
    %29 = vector.load %arg4[%c0_15, %c0_16] : memref<512x512xbf16, #tpu.memory_space<vmem>>, vector<512x512xbf16>
    %cst_17 = arith.constant dense<0.000000e+00> : vector<16x512xf32>
    %30 = tpu.matmul %28, %29, %cst_17 {dimension_numbers = #tpu.dot_dimension_numbers<[1], [0], [0], [1], [0, 0, 1, 1], [], []>} : vector<16x512xbf16>, vector<512x512xbf16>, vector<16x512xf32> -> vector<16x512xf32>
    %c2 = arith.constant 2 : index
    %c0_18 = arith.constant 0 : index
    %31 = vector.load %arg5[%c2, %c0_18] : memref<3x512xf32, #tpu.memory_space<vmem>>, vector<1x512xf32>
    %32 = vector.broadcast %31 : vector<1x512xf32> to vector<16x512xf32>
    %33 = arith.addf %30, %32 : vector<16x512xf32>
    %cst_19 = arith.constant 5.000000e-01 : f32
    %34 = vector.broadcast %cst_19 : f32 to vector<16x512xf32>
    %35 = arith.mulf %34, %33 : vector<16x512xf32>
    %36 = math.tanh %35 : vector<16x512xf32>
    %cst_20 = arith.constant 1.000000e+00 : f32
    %37 = vector.broadcast %cst_20 : f32 to vector<16x512xf32>
    %38 = arith.addf %36, %37 : vector<16x512xf32>
    %cst_21 = arith.constant 5.000000e-01 : f32
    %39 = vector.broadcast %cst_21 : f32 to vector<16x512xf32>
    %40 = arith.mulf %39, %38 : vector<16x512xf32>
    %41 = arith.mulf %33, %40 : vector<16x512xf32>
    %42 = arith.truncf %41 : vector<16x512xf32> to vector<16x512xbf16>
    %c0_22 = arith.constant 0 : index
    %c0_23 = arith.constant 0 : index
    %43 = vector.load %arg6[%c0_22, %c0_23] : memref<512x128xbf16, #tpu.memory_space<vmem>>, vector<512x128xbf16>
    %cst_24 = arith.constant dense<0.000000e+00> : vector<16x128xf32>
    %44 = tpu.matmul %42, %43, %cst_24 {dimension_numbers = #tpu.dot_dimension_numbers<[1], [0], [0], [1], [0, 0, 1, 1], [], []>} : vector<16x512xbf16>, vector<512x128xbf16>, vector<16x128xf32> -> vector<16x128xf32>
    %c0_25 = arith.constant 0 : index
    %c0_26 = arith.constant 0 : index
    %45 = vector.load %arg7[%c0_25, %c0_26] : memref<1x128xf32, #tpu.memory_space<vmem>>, vector<1x128xf32>
    %46 = vector.broadcast %45 : vector<1x128xf32> to vector<16x128xf32>
    %47 = arith.addf %44, %46 : vector<16x128xf32>
    %48 = tpu.iota {dimensions = array<i32: 1>} : vector<16x128xi32>
    %cst_27 = arith.constant -2.000000e+01 : f32
    %cst_28 = arith.constant 2.000000e+00 : f32
    %49 = vector.broadcast %cst_27 : f32 to vector<16x128xf32>
    %50 = arith.maximumf %49, %47 : vector<16x128xf32>
    %51 = vector.broadcast %cst_28 : f32 to vector<16x128xf32>
    %52 = arith.minimumf %51, %50 : vector<16x128xf32>
    %53 = math.exp %52 : vector<16x128xf32>
    %c1_i32 = arith.constant 1 : i32
    %54 = vector.broadcast %c1_i32 : i32 to vector<16x128xi32>
    %55 = arith.cmpi eq, %48, %54 : vector<16x128xi32>
    %56 = arith.select %55, %53, %47 : vector<16x128xi1>, vector<16x128xf32>
    %c0_29 = arith.constant 0 : index
    %c0_30 = arith.constant 0 : index
    %57 = vector.load %arg8[%c0_29, %c0_30] : memref<16x128xf32, #tpu.memory_space<vmem>>, vector<16x128xf32>
    tpu.vector_store %arg8[%c0_29, %c0_30], %56 {strides = array<i32>} : memref<16x128xf32, #tpu.memory_space<vmem>>, vector<16x128xf32>,
    return
  }
  func.func @transform_0(%arg0: i32) -> (i32, i32) {
    %c0_i32 = arith.constant 0 : i32
    %c0_i32_0 = arith.constant 0 : i32
    return %arg0, %c0_i32 : i32, i32
  }
  func.func @transform_1(%arg0: i32) -> (i32, i32) {
    %c0_i32 = arith.constant 0 : i32
    %c0_i32_0 = arith.constant 0 : i32
    %c0_i32_1 = arith.constant 0 : i32
    return %c0_i32, %c0_i32_0 : i32, i32
  }
  func.func @transform_2(%arg0: i32) -> (i32, i32) {
    %c0_i32 = arith.constant 0 : i32
    %c0_i32_0 = arith.constant 0 : i32
    %c0_i32_1 = arith.constant 0 : i32
    return %c0_i32, %c0_i32_0 : i32, i32
  }
  func.func @transform_3(%arg0: i32) -> (i32, i32) {
    %c0_i32 = arith.constant 0 : i32
    %c0_i32_0 = arith.constant 0 : i32
    %c0_i32_1 = arith.constant 0 : i32
    return %c0_i32, %c0_i32_0 : i32, i32
  }
  func.func @transform_4(%arg0: i32) -> (i32, i32) {
    %c0_i32 = arith.constant 0 : i32
    %c0_i32_0 = arith.constant 0 : i32
    %c0_i32_1 = arith.constant 0 : i32
    return %c0_i32, %c0_i32_0 : i32, i32
  }
  func.func @transform_5(%arg0: i32) -> (i32, i32) {
    %c0_i32 = arith.constant 0 : i32
    %c0_i32_0 = arith.constant 0 : i32
    %c0_i32_1 = arith.constant 0 : i32
    return %c0_i32, %c0_i32_0 : i32, i32
  }
  func.func @transform_6(%arg0: i32) -> (i32, i32) {
    %c0_i32 = arith.constant 0 : i32
    %c0_i32_0 = arith.constant 0 : i32
    %c0_i32_1 = arith.constant 0 : i32
    return %c0_i32, %c0_i32_0 : i32, i32
  }
  func.func @transform_7(%arg0: i32) -> (i32, i32) {
    %c0_i32 = arith.constant 0 : i32
    %c0_i32_0 = arith.constant 0 : i32
    return %arg0, %c0_i32 : i32, i32
  }
}

</mosaic_0001>

<bundles_post_ra>
// kernel: tpu_custom_call.1
= control target key start
LH: loop header
LB: loop body
LE: loop exit
PB: predicated region body
PF: predicated region fallthrough
CT: control target
= control target key end

     0   :  { %12 = vsyncpa [#allocation3], 0  ;;  %s4554_s0 = inlined_call_operand.vmem [shape: bf16[16,8], index: 0, kind: input, shape index: {}]   ;;  %s4555_s1 = inlined_call_operand.hbm [shape: bf16[8,512], index: 1, kind: input, shape index: {}]   ;;  %s4556_s2 = inlined_call_operand.hbm [shape: bf16[512,512], index: 2, kind: input, shape index: {}]   ;;  %s4557_s3 = inlined_call_operand.hbm [shape: bf16[512,512], index: 3, kind: input, shape index: {}]   ;;  %s4558_s4 = inlined_call_operand.hbm [shape: f32[3,512], index: 4, kind: input, shape index: {}]   ;;  %s4559_s5 = inlined_call_operand.hbm [shape: bf16[512,128], index: 5, kind: input, shape index: {}]   ;;  %s4560_s6 = inlined_call_operand.vmem [shape: f32[1,128], index: 6, kind: input, shape index: {}]   ;;  %s4561_s7 = inlined_call_operand.hbm [shape: f32[16,128], index: 7, kind: output, shape index: {}]  }
   0x1   :  { %13 = vsyncpa [#allocation6], 0 }
   0x2   :  { %14 = vsyncpa [#allocation9], 0  ;;  %s33_s26 = sshll.u32 %s4556_s2, 4  ;;  %s34_s26 = int_to_ptr.hbm [resolvable:$true] %s33_s26 }
   0x3   :  { %15 = vsyncpa [#allocation4], 0  ;;  %s4360_s27 = smov [#allocation5]   ;;  %s60_s8 = sshll.u32 %s4558_s4, 4  ;;  %s61_s8 = int_to_ptr.hbm [resolvable:$true] %s60_s8 }
   0x4   :  { %s35_s28 = sshll.u32 %s4360_s27, 4  ;;  %s4361_s9 = smov 256   ;;  %s36_s28 = int_to_ptr.vmem [resolvable:$true] %s35_s28 }
   0x5   :  { %s4362_s10 = smov 16   ;;  %s4363_s11 = smov [#allocation8]  }
   0x6   :  { %41 = dma.hbm_to_vmem [thread:$0]  %s34_s26, 16384, %s36_s28, [#allocation6], %s4361_s9, %s4361_s9, %s4362_s10  }
   0x7   :  { %s62_s12 = sshll.u32 %s4363_s11, 4  ;;  %s23_s15 = sshll.u32 %s4555_s1, 4  ;;  %s63_s12 = int_to_ptr.vmem [resolvable:$true] %s62_s12  ;;  %s24_s15 = int_to_ptr.hbm [resolvable:$true] %s23_s15 }
   0x8   :  { %65 = dma.hbm_to_vmem [thread:$0]  %s61_s8, 256, %s63_s12, [#allocation9]  }
   0x9   :  { %s46_s17 = sshll.u32 %s4557_s3, 4  ;;  %s4364_s18 = smov [#allocation2]   ;;  %s47_s17 = int_to_ptr.hbm [resolvable:$true] %s46_s17 }
   0xa   :  { %s25_s19 = sshll.u32 %s4364_s18, 4  ;;  %s4365_s4 = smov [#allocation7]   ;;  %s26_s19 = int_to_ptr.vmem [resolvable:$true] %s25_s19 }
   0xb   :  { %28 = dma.hbm_to_vmem [thread:$0]  %s24_s15, 256, %s26_s19, [#allocation3]  }
   0xc   :  { %s48_s20 = sshll.u32 %s4365_s4, 4  ;;  %s70_s23 = sshll.u32 %s4559_s5, 4  ;;  %s49_s20 = int_to_ptr.vmem [resolvable:$true] %s48_s20  ;;  %s71_s23 = int_to_ptr.hbm [resolvable:$true] %s70_s23 }
   0xd   :  { %54 = dma.hbm_to_vmem [thread:$0]  %s47_s17, 16384, %s49_s20, [#allocation6], %s4361_s9, %s4361_s9, %s4362_s10  }
   0xe   :  { %s4366_s1 = smov [#allocation10]   ;;  %s4367_s25 = smov 64  }
   0xf   :  { %s72_s24 = sshll.u32 %s4366_s1, 4  ;;  %s4368_s26 = smov 4   ;;  %s73_s24 = int_to_ptr.vmem [resolvable:$true] %s72_s24 }
  0x10   :  { %78 = dma.hbm_to_vmem [thread:$0]  %s71_s23, 4096, %s73_s24, [#allocation9], %s4367_s25, %s4367_s25, %s4368_s26  }
  0x11   :  { %4352 = dma.done.wait [#allocation3], 256  }
  0x12   :  { %4353 = vsyncadd [#allocation3], 4294967040 }
  0x13   :  { %4354 = dma.done.wait [#allocation6], 32768  }
  0x14   :  { %4355 = vsyncadd [#allocation6], 4294934528 }
  0x15   :  { %4356 = dma.done.wait [#allocation9], 4352  }
  0x16   :  { %4357 = vsyncadd [#allocation9], 4294962944  ;;  %v104_v0 = vld [vmem:[#allocation2] sm:$0xff]  ;;  %v105_v1 = vld [vmem:[#allocation2 + $0x8] sm:$0xff]  ;;  %vm135_vm0 = vcmask 1043456   ;;  %vm131_vm1 = vcmask 64512  }
  0x17   :  { %v123_v2 = vunpack.c.l.b16 %v104_v0  ;;  %v124_v3 = vunpack.c.h.b16 %v104_v0  ;;  %v125_v4 = vunpack.c.l.b16 %v105_v1  ;;  %v126_v5 = vunpack.c.h.b16 %v105_v1  ;;  %v2816_v6 = vld [vmem:[#allocation5 + $0xe0] sm:$0xf]  ;;  %v3885_v7 = vld [vmem:[#allocation5 + $0xec] sm:$0xf0]  ;;  %s2679_s8 = sshll.u32 %s4561_s7, 4  ;;  %s4370_s9 = smov 128   ;;  %s2680_s8 = int_to_ptr.hbm [resolvable:$true] %s2679_s8 }
  0x18   :  { %v2944_v8 = vld [vmem:[#allocation5 + $0x1e0] sm:$0xf]  ;;  %v3917_v9 = vld [vmem:[#allocation5 + $0x1ec] sm:$0xf0]  ;;  %v2817_v19 = vor.u32 %v3885_v7, %v2816_v6  ;;  %s4371_s10 = smov 8  }
  0x19   :  { %v127_v10 = vpack.c.b16 %v123_v2, %v123_v2  ;;  %v128_v11 = vpack.c.b16 %v124_v3, %v124_v3  ;;  %v129_v12 = vpack.c.b16 %v125_v4, %v125_v4  ;;  %v130_v13 = vpack.c.b16 %v126_v5, %v126_v5  ;;  %v3854_v14 = vld [vmem:[%s4554_s0] sm:$0xff]  ;;  %v2800_v15 = vld [vmem:[#allocation5 + $0xc0] sm:$0xf] }
  0x1a   :  { %v3881_v16 = vld [vmem:[#allocation5 + $0xcc] sm:$0xf0]  ;;  %v2928_v17 = vld [vmem:[#allocation5 + $0x1c0] sm:$0xf]  ;;  %v2945_v20 = vor.u32 %v3917_v9, %v2944_v8 }
  0x1b   :  { %v3072_v18 = vld [vmem:[#allocation5 + $0x2e0] sm:$0xf]  ;;  %v3949_v21 = vld [vmem:[#allocation5 + $0x2ec] sm:$0xf0]  ;;  %v137_v24 = vsel %vm135_vm0, %v127_v10, 0  ;;  %v140_v25 = vsel %vm135_vm0, %v128_v11, 0  ;;  %v2801_v33 = vor.u32 %v3881_v16, %v2800_v15 }
  0x1c   :  { %v3200_v22 = vld [vmem:[#allocation5 + $0x3e0] sm:$0xf]  ;;  %v3981_v23 = vld [vmem:[#allocation5 + $0x3ec] sm:$0xf0]  ;;  %v143_v26 = vsel %vm135_vm0, %v129_v12, 0  ;;  %v146_v27 = vsel %vm135_vm0, %v130_v13, 0  ;;  %155 = vmatpush.bf16.msra.mxu0 %v137_v24  ;;  %169 = vmatpush.bf16.msra.mxu1 %v140_v25  ;;  %v3073_v29 = vor.u32 %v3949_v21, %v3072_v18 }
  0x1d   :  { %v3913_v28 = vld [vmem:[#allocation5 + $0x1cc] sm:$0xf0]  ;;  %183 = vmatpush.bf16.msra.mxu2 %v143_v26  ;;  %197 = vmatpush.bf16.msra.mxu3 %v146_v27  ;;  %v3201_v30 = vor.u32 %v3981_v23, %v3200_v22  ;;  %v2784_v31 = vld [vmem:[#allocation5 + $0xa0] sm:$0xf] }
  0x1e   :  { %v3056_v32 = vld [vmem:[#allocation5 + $0x2c0] sm:$0xf]  ;;  %v2929_v34 = vor.u32 %v3913_v28, %v2928_v17  ;;  %v3945_v35 = vld [vmem:[#allocation5 + $0x2cc] sm:$0xf0] }
  0x1f   :  { %v3184_v36 = vld [vmem:[#allocation5 + $0x3c0] sm:$0xf]  ;;  %v3977_v37 = vld [vmem:[#allocation5 + $0x3cc] sm:$0xf0]  ;;  %2698 = vmatmul.msk.bf16.vlgmr.msra.gmra.mxu0 %vm131_vm1, %v3854_v14  ;;  %2699 = vmatmul.msk.bf16.vlgmr.msra.gmra.mxu1 %vm131_vm1, %v3854_v14  ;;  %v3057_v41 = vor.u32 %v3945_v35, %v3056_v32  ;;  %v3915_v35 = vld [vmem:[#allocation5 + $0x1e4] sm:$0xf] }
  0x20   :  { %1027 = vmatpush.bf16.msrb.mxu0 %v2817_v19  ;;  %1041 = vmatpush.bf16.msrb.mxu1 %v2945_v20  ;;  %v3877_v38 = vld [vmem:[#allocation5 + $0xac] sm:$0xf0]  ;;  %v2912_v39 = vld [vmem:[#allocation5 + $0x1a0] sm:$0xf]  ;;  %v3185_v42 = vor.u32 %v3977_v37, %v3184_v36  ;;  %v2946_v36 = vld [vmem:[#allocation5 + $0x1f0] sm:$0xf0] }
  0x21   :  { %v3909_v40 = vld [vmem:[#allocation5 + $0x1ac] sm:$0xf0]  ;;  %2700 = vmatmul.msk.bf16.vlgmr.msra.gmra.mxu2 %vm131_vm1, %v3854_v14  ;;  %2701 = vmatmul.msk.bf16.vlgmr.msra.gmra.mxu3 %vm131_vm1, %v3854_v14  ;;  %v2768_v43 = vld [vmem:[#allocation5 + $0x80] sm:$0xf]  ;;  %v2785_v45 = vor.u32 %v3877_v38, %v2784_v31 }
  0x22   :  { %1055 = vmatpush.bf16.msrb.mxu2 %v3073_v29  ;;  %1069 = vmatpush.bf16.msrb.mxu3 %v3201_v30  ;;  %v3040_v44 = vld [vmem:[#allocation5 + $0x2a0] sm:$0xf]  ;;  %v2913_v46 = vor.u32 %v3909_v40, %v2912_v39  ;;  %v3941_v47 = vld [vmem:[#allocation5 + $0x2ac] sm:$0xf0]  ;;  %v2949_v40 = vor.u32 %v3915_v35, %v2946_v36  ;;  %v3154_v35 = vld [vmem:[#allocation5 + $0x390] sm:$0xf0] }
  0x23   :  { %v3168_v48 = vld [vmem:[#allocation5 + $0x3a0] sm:$0xf]  ;;  %v3973_v49 = vld [vmem:[#allocation5 + $0x3ac] sm:$0xf0]  ;;  %v3041_v53 = vor.u32 %v3941_v47, %v3040_v44  ;;  %v3879_v47 = vld [vmem:[#allocation5 + $0xc4] sm:$0xf] }
  0x24   :  { %1028 = vmatpush.bf16.msrb.mxu0 %v2801_v33  ;;  %1042 = vmatpush.bf16.msrb.mxu1 %v2929_v34  ;;  %v3873_v50 = vld [vmem:[#allocation5 + $0x8c] sm:$0xf0]  ;;  %v2896_v51 = vld [vmem:[#allocation5 + $0x180] sm:$0xf]  ;;  %v3169_v54 = vor.u32 %v3973_v49, %v3168_v48  ;;  %v3883_v33 = vld [vmem:[#allocation5 + $0xe4] sm:$0xf] }
  0x25   :  { %v3905_v52 = vld [vmem:[#allocation5 + $0x18c] sm:$0xf0]  ;;  %v2752_v55 = vld [vmem:[#allocation5 + $0x60] sm:$0xf]  ;;  %v2769_v57 = vor.u32 %v3873_v50, %v2768_v43  ;;  %v2818_v34 = vld [vmem:[#allocation5 + $0xf0] sm:$0xf0] }
  0x26   :  { %1056 = vmatpush.bf16.msrb.mxu2 %v3057_v41  ;;  %1070 = vmatpush.bf16.msrb.mxu3 %v3185_v42  ;;  %v3024_v56 = vld [vmem:[#allocation5 + $0x280] sm:$0xf]  ;;  %v2897_v58 = vor.u32 %v3905_v52, %v2896_v51  ;;  %v3937_v59 = vld [vmem:[#allocation5 + $0x28c] sm:$0xf0]  ;;  %v2821_v39 = vor.u32 %v3883_v33, %v2818_v34  ;;  %v2802_v48 = vld [vmem:[#allocation5 + $0xd0] sm:$0xf0] }
  0x27   :  { %v3152_v60 = vld [vmem:[#allocation5 + $0x380] sm:$0xf]  ;;  %v3969_v61 = vld [vmem:[#allocation5 + $0x38c] sm:$0xf0]  ;;  %v3025_v1 = vor.u32 %v3937_v59, %v3024_v56  ;;  %v3911_v49 = vld [vmem:[#allocation5 + $0x1c4] sm:$0xf]  ;;  %v2805_v50 = vor.u32 %v3879_v47, %v2802_v48 }
  0x28   :  { %1029 = vmatpush.bf16.msrb.mxu0 %v2785_v45  ;;  %1043 = vmatpush.bf16.msrb.mxu1 %v2913_v46  ;;  %v3869_v62 = vld [vmem:[#allocation5 + $0x6c] sm:$0xf0]  ;;  %v2880_v63 = vld [vmem:[#allocation5 + $0x160] sm:$0xf]  ;;  %v3153_v2 = vor.u32 %v3969_v61, %v3152_v60  ;;  %v2930_v51 = vld [vmem:[#allocation5 + $0x1d0] sm:$0xf0] }
  0x29   :  { %v3901_v0 = vld [vmem:[#allocation5 + $0x16c] sm:$0xf0]  ;;  %v2736_v3 = vld [vmem:[#allocation5 + $0x40] sm:$0xf]  ;;  %v2753_v6 = vor.u32 %v3869_v62, %v2752_v55  ;;  %v3074_v60 = vld [vmem:[#allocation5 + $0x2f0] sm:$0xf0] }
  0x2a   :  { %1057 = vmatpush.bf16.msrb.mxu2 %v3041_v53  ;;  %1071 = vmatpush.bf16.msrb.mxu3 %v3169_v54  ;;  %v3865_v4 = vld [vmem:[#allocation5 + $0x4c] sm:$0xf0]  ;;  %v3008_v5 = vld [vmem:[#allocation5 + $0x260] sm:$0xf]  ;;  %v2881_v7 = vor.u32 %v3901_v0, %v2880_v63  ;;  %v2933_v54 = vor.u32 %v3911_v49, %v2930_v51  ;;  %v3979_v61 = vld [vmem:[#allocation5 + $0x3e4] sm:$0xf] }
  0x2b   :  { %v3933_v8 = vld [vmem:[#allocation5 + $0x26c] sm:$0xf0]  ;;  %v3136_v9 = vld [vmem:[#allocation5 + $0x360] sm:$0xf]  ;;  %v2737_v17 = vor.u32 %v3865_v4, %v2736_v3  ;;  %v3202_v62 = vld [vmem:[#allocation5 + $0x3f0] sm:$0xf0] }
  0x2c   :  { %1030 = vmatpush.bf16.msrb.mxu0 %v2769_v57  ;;  %1044 = vmatpush.bf16.msrb.mxu1 %v2897_v58  ;;  %v3965_v10 = vld [vmem:[#allocation5 + $0x36c] sm:$0xf0]  ;;  %v2864_v11 = vld [vmem:[#allocation5 + $0x140] sm:$0xf]  ;;  %v3009_v13 = vor.u32 %v3933_v8, %v3008_v5  ;;  %v3947_v58 = vld [vmem:[#allocation5 + $0x2e4] sm:$0xf]  ;;  %v3205_v0 = vor.u32 %v3979_v61, %v3202_v62 }
  0x2d   :  { %v3897_v12 = vld [vmem:[#allocation5 + $0x14c] sm:$0xf0]  ;;  %v3137_v14 = vor.u32 %v3965_v10, %v3136_v9  ;;  %v2720_v15 = vld [vmem:[#allocation5 + $0x20] sm:$0xf]  ;;  %v3077_v63 = vor.u32 %v3947_v58, %v3074_v60  ;;  %v3907_v4 = vld [vmem:[#allocation5 + $0x1a4] sm:$0xf] }
  0x2e   :  { %1058 = vmatpush.bf16.msrb.mxu2 %v3025_v1  ;;  %1072 = vmatpush.bf16.msrb.mxu3 %v3153_v2  ;;  %v2992_v16 = vld [vmem:[#allocation5 + $0x240] sm:$0xf]  ;;  %v2865_v18 = vor.u32 %v3897_v12, %v2864_v11  ;;  %v3929_v19 = vld [vmem:[#allocation5 + $0x24c] sm:$0xf0]  ;;  %v3875_v1 = vld [vmem:[#allocation5 + $0xa4] sm:$0xf] }
  0x2f   :  { %v3120_v20 = vld [vmem:[#allocation5 + $0x340] sm:$0xf]  ;;  %v3961_v21 = vld [vmem:[#allocation5 + $0x34c] sm:$0xf0]  ;;  %v2993_v25 = vor.u32 %v3929_v19, %v2992_v16  ;;  %v2786_v2 = vld [vmem:[#allocation5 + $0xb0] sm:$0xf0] }
  0x30   :  { %1031 = vmatpush.bf16.msrb.mxu0 %v2753_v6  ;;  %1045 = vmatpush.bf16.msrb.mxu1 %v2881_v7  ;;  %v3861_v22 = vld [vmem:[#allocation5 + $0x2c] sm:$0xf0]  ;;  %v2848_v23 = vld [vmem:[#allocation5 + $0x120] sm:$0xf]  ;;  %v3121_v26 = vor.u32 %v3961_v21, %v3120_v20  ;;  %v2789_v3 = vor.u32 %v3875_v1, %v2786_v2  ;;  %v2914_v5 = vld [vmem:[#allocation5 + $0x1b0] sm:$0xf0] }
  0x31   :  { %v3893_v24 = vld [vmem:[#allocation5 + $0x12c] sm:$0xf0]  ;;  %v2721_v27 = vor.u32 %v3861_v22, %v2720_v15  ;;  %v2704_v29 = vld [vmem:[#allocation5] sm:$0xf]  ;;  %v2917_v6 = vor.u32 %v3907_v4, %v2914_v5  ;;  %v3943_v7 = vld [vmem:[#allocation5 + $0x2c4] sm:$0xf] }
  0x32   :  { %1059 = vmatpush.bf16.msrb.mxu2 %v3009_v13  ;;  %1073 = vmatpush.bf16.msrb.mxu3 %v3137_v14  ;;  %v2849_v28 = vor.u32 %v3893_v24, %v2848_v23  ;;  %v3857_v30 = vld [vmem:[#allocation5 + $0xc] sm:$0xf0]  ;;  %v2832_v31 = vld [vmem:[#allocation5 + $0x100] sm:$0xf]  ;;  %v3058_v8 = vld [vmem:[#allocation5 + $0x2d0] sm:$0xf0] }
  0x33   :  { %v3889_v32 = vld [vmem:[#allocation5 + $0x10c] sm:$0xf0]  ;;  %v2705_v37 = vor.u32 %v3857_v30, %v2704_v29  ;;  %v2976_v41 = vld [vmem:[#allocation5 + $0x220] sm:$0xf]  ;;  %v3975_v9 = vld [vmem:[#allocation5 + $0x3c4] sm:$0xf]  ;;  %v3061_v10 = vor.u32 %v3943_v7, %v3058_v8 }
  0x34   :  { %1032 = vmatpush.bf16.msrb.mxu0 %v2737_v17  ;;  %1046 = vmatpush.bf16.msrb.mxu1 %v2865_v18  ;;  %v2833_v38 = vor.u32 %v3889_v32, %v2832_v31  ;;  %v3925_v42 = vld [vmem:[#allocation5 + $0x22c] sm:$0xf0]  ;;  %v3104_v43 = vld [vmem:[#allocation5 + $0x320] sm:$0xf]  ;;  %v3186_v11 = vld [vmem:[#allocation5 + $0x3d0] sm:$0xf0] }
  0x35   :  { %v2977_v44 = vor.u32 %v3925_v42, %v2976_v41  ;;  %v3957_v45 = vld [vmem:[#allocation5 + $0x32c] sm:$0xf0]  ;;  %v2960_v52 = vld [vmem:[#allocation5 + $0x200] sm:$0xf]  ;;  %v3189_v12 = vor.u32 %v3975_v9, %v3186_v11  ;;  %v3871_v13 = vld [vmem:[#allocation5 + $0x84] sm:$0xf] }
  0x36   :  { %1060 = vmatpush.bf16.msrb.mxu2 %v2993_v25  ;;  %1074 = vmatpush.bf16.msrb.mxu3 %v3121_v26  ;;  %v3105_v46 = vor.u32 %v3957_v45, %v3104_v43  ;;  %v3921_v53 = vld [vmem:[#allocation5 + $0x20c] sm:$0xf0]  ;;  %v3088_v56 = vld [vmem:[#allocation5 + $0x300] sm:$0xf]  ;;  %v2770_v14 = vld [vmem:[#allocation5 + $0x90] sm:$0xf0] }
  0x37   :  { %v2961_v55 = vor.u32 %v3921_v53, %v2960_v52  ;;  %v3953_v57 = vld [vmem:[#allocation5 + $0x30c] sm:$0xf0]  ;;  %v3903_v15 = vld [vmem:[#allocation5 + $0x184] sm:$0xf]  ;;  %v2773_v16 = vor.u32 %v3871_v13, %v2770_v14  ;;  %v2898_v17 = vld [vmem:[#allocation5 + $0x190] sm:$0xf0] }
  0x38   :  { %1033 = vmatpush.bf16.msrb.mxu0 %v2721_v27  ;;  %1047 = vmatpush.bf16.msrb.mxu1 %v2849_v28  ;;  %v3089_v59 = vor.u32 %v3953_v57, %v3088_v56  ;;  %v2901_v18 = vor.u32 %v3903_v15, %v2898_v17  ;;  %v3939_v19 = vld [vmem:[#allocation5 + $0x2a4] sm:$0xf]  ;;  %v3042_v20 = vld [vmem:[#allocation5 + $0x2b0] sm:$0xf0] }
  0x39   :  { %v3971_v21 = vld [vmem:[#allocation5 + $0x3a4] sm:$0xf]  ;;  %v3045_v22 = vor.u32 %v3939_v19, %v3042_v20  ;;  %v3170_v23 = vld [vmem:[#allocation5 + $0x3b0] sm:$0xf0] }
  0x3a   :  { %1061 = vmatpush.bf16.msrb.mxu2 %v2977_v44  ;;  %1075 = vmatpush.bf16.msrb.mxu3 %v3105_v46  ;;  %v3173_v24 = vor.u32 %v3971_v21, %v3170_v23  ;;  %v3867_v25 = vld [vmem:[#allocation5 + $0x64] sm:$0xf]  ;;  %v2754_v26 = vld [vmem:[#allocation5 + $0x70] sm:$0xf0] }
  0x3b   :  { %v3899_v27 = vld [vmem:[#allocation5 + $0x164] sm:$0xf]  ;;  %v2757_v28 = vor.u32 %v3867_v25, %v2754_v26  ;;  %v2882_v29 = vld [vmem:[#allocation5 + $0x170] sm:$0xf0] }
  0x3c   :  { %1034 = vmatpush.bf16.msrb.mxu0 %v2705_v37  ;;  %1048 = vmatpush.bf16.msrb.mxu1 %v2833_v38  ;;  %v2885_v30 = vor.u32 %v3899_v27, %v2882_v29  ;;  %v3935_v31 = vld [vmem:[#allocation5 + $0x284] sm:$0xf]  ;;  %v3026_v32 = vld [vmem:[#allocation5 + $0x290] sm:$0xf0] }
  0x3d   :  { %v3967_v33 = vld [vmem:[#allocation5 + $0x384] sm:$0xf]  ;;  %v3029_v34 = vor.u32 %v3935_v31, %v3026_v32  ;;  %v2738_v38 = vld [vmem:[#allocation5 + $0x50] sm:$0xf0] }
  0x3e   :  { %1062 = vmatpush.bf16.msrb.mxu2 %v2961_v55  ;;  %1076 = vmatpush.bf16.msrb.mxu3 %v3089_v59  ;;  %v3157_v36 = vor.u32 %v3967_v33, %v3154_v35  ;;  %v3863_v37 = vld [vmem:[#allocation5 + $0x44] sm:$0xf]  ;;  %v2866_v41 = vld [vmem:[#allocation5 + $0x150] sm:$0xf0] }
  0x3f   :  { %v3931_v43 = vld [vmem:[#allocation5 + $0x264] sm:$0xf]  ;;  %v3010_v44 = vld [vmem:[#allocation5 + $0x270] sm:$0xf0] }
  0x40   :  { %1083 = vmatpush.bf16.msra.mxu0 %v2821_v39  ;;  %1097 = vmatpush.bf16.msra.mxu1 %v2949_v40  ;;  %v3895_v39 = vld [vmem:[#allocation5 + $0x144] sm:$0xf]  ;;  %v2741_v40 = vor.u32 %v3863_v37, %v2738_v38  ;;  %v3013_v46 = vor.u32 %v3931_v43, %v3010_v44  ;;  %v3138_v47 = vld [vmem:[#allocation5 + $0x370] sm:$0xf0] }
  0x41   :  { %v2869_v42 = vor.u32 %v3895_v39, %v2866_v41  ;;  %v3963_v45 = vld [vmem:[#allocation5 + $0x364] sm:$0xf]  ;;  %v2850_v53 = vld [vmem:[#allocation5 + $0x130] sm:$0xf0] }
  0x42   :  { %1111 = vmatpush.bf16.msra.mxu2 %v3077_v63  ;;  %1125 = vmatpush.bf16.msra.mxu3 %v3205_v0  ;;  %v3141_v48 = vor.u32 %v3963_v45, %v3138_v47  ;;  %v3859_v49 = vld [vmem:[#allocation5 + $0x24] sm:$0xf]  ;;  %v2994_v56 = vld [vmem:[#allocation5 + $0x250] sm:$0xf0] }
  0x43   :  { %v3891_v51 = vld [vmem:[#allocation5 + $0x124] sm:$0xf]  ;;  %v3122_v60 = vld [vmem:[#allocation5 + $0x350] sm:$0xf0] }
  0x44   :  { %1084 = vmatpush.bf16.msra.mxu0 %v2805_v50  ;;  %1098 = vmatpush.bf16.msra.mxu1 %v2933_v54  ;;  %v2722_v50 = vld [vmem:[#allocation5 + $0x30] sm:$0xf0]  ;;  %v2853_v54 = vor.u32 %v3891_v51, %v2850_v53  ;;  %v3927_v55 = vld [vmem:[#allocation5 + $0x244] sm:$0xf] }
  0x45   :  { %v2725_v52 = vor.u32 %v3859_v49, %v2722_v50  ;;  %v3959_v57 = vld [vmem:[#allocation5 + $0x344] sm:$0xf]  ;;  %v2997_v59 = vor.u32 %v3927_v55, %v2994_v56  ;;  %v2706_v63 = vld [vmem:[#allocation5 + $0x10] sm:$0xf0] }
  0x46   :  { %1112 = vmatpush.bf16.msra.mxu2 %v3061_v10  ;;  %1126 = vmatpush.bf16.msra.mxu3 %v3189_v12  ;;  %v4438_v58 = vld [vmem:[#allocation8] ss:$4 sm:$0xf]  ;;  %v3125_v61 = vor.u32 %v3959_v57, %v3122_v60  ;;  %v2834_v2 = vld [vmem:[#allocation5 + $0x110] sm:$0xf0] }
  0x47   :  { %v3855_v62 = vld [vmem:[#allocation5 + $0x4] sm:$0xf]  ;;  %v109_v4 = vperm.slane %v4438_v58, 1  ;;  %v2978_v7 = vld [vmem:[#allocation5 + $0x230] sm:$0xf0]  ;;  %v110_v23 = vperm.slane %v4438_v58, 2 }
  0x48   :  { %1085 = vmatpush.bf16.msra.mxu0 %v2789_v3  ;;  %1099 = vmatpush.bf16.msra.mxu1 %v2917_v6  ;;  %v3887_v0 = vld [vmem:[#allocation5 + $0x104] sm:$0xf]  ;;  %v2709_v1 = vor.u32 %v3855_v62, %v2706_v63  ;;  %v108_v3 = vperm.slane %v4438_v58, 0  ;;  %v3106_v10 = vld [vmem:[#allocation5 + $0x330] sm:$0xf0] }
  0x49   :  { %v2837_v5 = vor.u32 %v3887_v0, %v2834_v2  ;;  %v3923_v6 = vld [vmem:[#allocation5 + $0x224] sm:$0xf]  ;;  %v2962_v17 = vld [vmem:[#allocation5 + $0x210] sm:$0xf0]  ;;  %v2952_v62 = vld [vmem:[#allocation5 + $0x1e8] sm:$0xf] }
  0x4a   :  { %1113 = vmatpush.bf16.msra.mxu2 %v3045_v22  ;;  %1127 = vmatpush.bf16.msra.mxu3 %v3173_v24  ;;  %v3955_v8 = vld [vmem:[#allocation5 + $0x324] sm:$0xf]  ;;  %v2981_v9 = vor.u32 %v3923_v6, %v2978_v7  ;;  %v3090_v20 = vld [vmem:[#allocation5 + $0x310] sm:$0xf0]  ;;  %v111_v24 = vperm.slane %v4438_v58, 3 }
  0x4b   :  { %v3109_v11 = vor.u32 %v3955_v8, %v3106_v10  ;;  %v3951_v19 = vld [vmem:[#allocation5 + $0x304] sm:$0xf]  ;;  %v2824_v58 = vld [vmem:[#allocation5 + $0xe8] sm:$0xf]  ;;  %v3918_v63 = vld [vmem:[#allocation5 + $0x1f4] sm:$0xf0] }
  0x4c   :  { %1086 = vmatpush.bf16.msra.mxu0 %v2773_v16  ;;  %1100 = vmatpush.bf16.msra.mxu1 %v2901_v18  ;;  %v3919_v16 = vld [vmem:[#allocation5 + $0x204] sm:$0xf]  ;;  %v3093_v21 = vor.u32 %v3951_v19, %v3090_v20  ;;  %v2953_v10 = vor.u32 %v3918_v63, %v2952_v62  ;;  %v3950_v20 = vld [vmem:[#allocation5 + $0x2f4] sm:$0xf0]  ;;  %v3032_v62 = vld [vmem:[#allocation5 + $0x288] sm:$0xf] }
  0x4d   :  { %v2965_v18 = vor.u32 %v3919_v16, %v2962_v17  ;;  %v3938_v63 = vld [vmem:[#allocation5 + $0x294] sm:$0xf0] }
  0x4e   :  { %1114 = vmatpush.bf16.msra.mxu2 %v3029_v34  ;;  %1128 = vmatpush.bf16.msra.mxu3 %v3157_v36 }
  0x50   :  { %1087 = vmatpush.bf16.msra.mxu0 %v2757_v28  ;;  %1101 = vmatpush.bf16.msra.mxu1 %v2885_v30 }
  0x52   :  { %1115 = vmatpush.bf16.msra.mxu2 %v3013_v46  ;;  %1129 = vmatpush.bf16.msra.mxu3 %v3141_v48 }
  0x54   :  { %1088 = vmatpush.bf16.msra.mxu0 %v2741_v40  ;;  %1102 = vmatpush.bf16.msra.mxu1 %v2869_v42 }
  0x56   :  { %1116 = vmatpush.bf16.msra.mxu2 %v2997_v59  ;;  %1130 = vmatpush.bf16.msra.mxu3 %v3125_v61  ;;  %v3886_v59 = vld [vmem:[#allocation5 + $0xf4] sm:$0xf0] }
  0x58   :  { %1089 = vmatpush.bf16.msra.mxu0 %v2725_v52  ;;  %1103 = vmatpush.bf16.msra.mxu1 %v2853_v54 }
  0x5a   :  { %1117 = vmatpush.bf16.msra.mxu2 %v2981_v9  ;;  %1131 = vmatpush.bf16.msra.mxu3 %v3109_v11  ;;  %v2808_v11 = vld [vmem:[#allocation5 + $0xc8] sm:$0xf] }
  0x5c   :  { %1090 = vmatpush.bf16.msra.mxu0 %v2709_v1  ;;  %1104 = vmatpush.bf16.msra.mxu1 %v2837_v5  ;;  %v2825_v5 = vor.u32 %v3886_v59, %v2824_v58  ;;  %v2888_v59 = vld [vmem:[#allocation5 + $0x168] sm:$0xf] }
  0x5e   :  { %1118 = vmatpush.bf16.msra.mxu2 %v2965_v18  ;;  %1132 = vmatpush.bf16.msra.mxu3 %v3093_v21  ;;  %v2936_v18 = vld [vmem:[#allocation5 + $0x1c8] sm:$0xf] }
  0x9c   :  { %v157_v12 = vpop.f32.mrf.mxu0  ;;  %v171_v13 = vpop.f32.mrf.mxu1 }
  0x9d   :  { %v158_v14 = vadd.f32 %v157_v12, %v108_v3  ;;  %v4442_v15 = vadd.f32 %v171_v13, %v109_v4  ;;  %v3882_v12 = vld [vmem:[#allocation5 + $0xd4] sm:$0xf0] }
  0x9f   :  { %v204_v22 = vmul.f32 0.5, %v158_v14  ;;  %v205_v25 = vmul.f32 0.5, %v4442_v15 }
  0xa1   :  { %4156 = vtanh.f32 %v204_v22  ;;  %v2809_v22 = vor.u32 %v3882_v12, %v2808_v11  ;;  %v3016_v11 = vld [vmem:[#allocation5 + $0x268] sm:$0xf]  ;;  %v3934_v12 = vld [vmem:[#allocation5 + $0x274] sm:$0xf0] }
  0xa2   :  { %4158 = vtanh.f32 %v205_v25 }
  0xa4   :  { %v185_v26 = vpop.f32.mrf.mxu2  ;;  %v199_v27 = vpop.f32.mrf.mxu3 }
  0xa5   :  { %v4447_v28 = vadd.f32 %v185_v26, %v110_v23  ;;  %v4449_v29 = vadd.f32 %v199_v27, %v111_v24  ;;  %v159_v30 = vpop.f32.mrf.mxu0  ;;  %v173_v31 = vpop.f32.mrf.mxu1 }
  0xa6   :  { %v160_v32 = vadd.f32 %v159_v30, %v108_v3  ;;  %v174_v33 = vadd.f32 %v173_v31, %v109_v4  ;;  %v2792_v30 = vld [vmem:[#allocation5 + $0xa8] sm:$0xf]  ;;  %v3878_v31 = vld [vmem:[#allocation5 + $0xb4] sm:$0xf0] }
  0xa7   :  { %v206_v34 = vmul.f32 0.5, %v4447_v28  ;;  %v207_v35 = vmul.f32 0.5, %v4449_v29  ;;  %v4157_v38 = vpop.eup %4156 }
  0xa8   :  { %v208_v36 = vmul.f32 0.5, %v160_v32  ;;  %v209_v37 = vmul.f32 0.5, %v174_v33  ;;  %v4159_v39 = vpop.eup %4158  ;;  %v220_v44 = vadd.f32 1.0, %v4157_v38 }
  0xa9   :  { %4160 = vtanh.f32 %v206_v34  ;;  %v221_v46 = vadd.f32 1.0, %v4159_v39  ;;  %v3064_v39 = vld [vmem:[#allocation5 + $0x2c8] sm:$0xf] }
  0xaa   :  { %4162 = vtanh.f32 %v207_v35  ;;  %v228_v52 = vmul.f32 0.5, %v220_v44  ;;  %v2920_v35 = vld [vmem:[#allocation5 + $0x1a8] sm:$0xf]  ;;  %v3978_v44 = vld [vmem:[#allocation5 + $0x3d4] sm:$0xf0] }
  0xab   :  { %4164 = vtanh.f32 %v208_v36  ;;  %v229_v54 = vmul.f32 0.5, %v221_v46  ;;  %v3910_v36 = vld [vmem:[#allocation5 + $0x1b4] sm:$0xf0] }
  0xac   :  { %4166 = vtanh.f32 %v209_v37  ;;  %v187_v40 = vpop.f32.mrf.mxu2  ;;  %v201_v41 = vpop.f32.mrf.mxu3  ;;  %v236_v0 = vmul.f32 %v228_v52, %v158_v14  ;;  %v3914_v14 = vld [vmem:[#allocation5 + $0x1d4] sm:$0xf0] }
  0xad   :  { %v188_v42 = vadd.f32 %v187_v40, %v110_v23  ;;  %v202_v43 = vadd.f32 %v201_v41, %v111_v24  ;;  %v237_v3 = vmul.f32 %v229_v54, %v4442_v15  ;;  %v3080_v15 = vld [vmem:[#allocation5 + $0x2e8] sm:$0xf]  ;;  %v3982_v24 = vld [vmem:[#allocation5 + $0x3f4] sm:$0xf0]  ;;  %v2937_v27 = vor.u32 %v3914_v14, %v2936_v18 }
  0xae   :  { %v3208_v23 = vld [vmem:[#allocation5 + $0x3e8] sm:$0xf]  ;;  %v3081_v34 = vor.u32 %v3950_v20, %v3080_v15  ;;  %v3946_v40 = vld [vmem:[#allocation5 + $0x2d4] sm:$0xf0]  ;;  %v3017_v20 = vor.u32 %v3934_v12, %v3016_v11  ;;  %v3944_v11 = vld [vmem:[#allocation5 + $0x2cc] sm:$0xf] }
  0xaf   :  { %v4161_v45 = vpop.eup %4160  ;;  %v210_v47 = vmul.f32 0.5, %v188_v42  ;;  %v211_v48 = vmul.f32 0.5, %v202_v43  ;;  %v3209_v38 = vor.u32 %v3982_v24, %v3208_v23  ;;  %v3065_v46 = vor.u32 %v3946_v40, %v3064_v39  ;;  %v3974_v54 = vld [vmem:[#allocation5 + $0x3b4] sm:$0xf0]  ;;  %v3000_v24 = vld [vmem:[#allocation5 + $0x248] sm:$0xf] }
  0xb0   :  { %v4163_v49 = vpop.eup %4162  ;;  %v222_v56 = vadd.f32 1.0, %v4161_v45  ;;  %v2921_v45 = vor.u32 %v3910_v36, %v2920_v35  ;;  %v3966_v18 = vld [vmem:[#allocation5 + $0x374] sm:$0xf0]  ;;  %v2826_v39 = vld [vmem:[#allocation5 + $0xf8] sm:$0xf0] }
  0xb1   :  { %v4165_v50 = vpop.eup %4164  ;;  %4168 = vtanh.f32 %v210_v47  ;;  %v223_v60 = vadd.f32 1.0, %v4163_v49  ;;  %v2904_v47 = vld [vmem:[#allocation5 + $0x188] sm:$0xf]  ;;  %v3862_v15 = vld [vmem:[#allocation5 + $0x34] sm:$0xf0] }
  0xb2   :  { %v4167_v51 = vpop.eup %4166  ;;  %v224_v53 = vadd.f32 1.0, %v4165_v50  ;;  %4170 = vtanh.f32 %v211_v48  ;;  %v230_v7 = vmul.f32 0.5, %v222_v56  ;;  %v3906_v48 = vld [vmem:[#allocation5 + $0x194] sm:$0xf0]  ;;  %v3048_v50 = vld [vmem:[#allocation5 + $0x2a8] sm:$0xf] }
  0xb3   :  { %v225_v55 = vadd.f32 1.0, %v4167_v51  ;;  %v231_v13 = vmul.f32 0.5, %v223_v60  ;;  %v3942_v51 = vld [vmem:[#allocation5 + $0x2b4] sm:$0xf0]  ;;  %v2760_v56 = vld [vmem:[#allocation5 + $0x68] sm:$0xf] }
  0xb4   :  { %v232_v57 = vmul.f32 0.5, %v224_v53  ;;  %v238_v25 = vmul.f32 %v230_v7, %v4447_v28  ;;  %v2793_v28 = vor.u32 %v3878_v31, %v2792_v30  ;;  %v3176_v53 = vld [vmem:[#allocation5 + $0x3a8] sm:$0xf]  ;;  %v3049_v58 = vor.u32 %v3942_v51, %v3048_v50  ;;  %v3902_v60 = vld [vmem:[#allocation5 + $0x174] sm:$0xf0] }
  0xb5   :  { %v233_v61 = vmul.f32 0.5, %v225_v55  ;;  %v2905_v55 = vor.u32 %v3906_v48, %v2904_v47  ;;  %v2872_v7 = vld [vmem:[#allocation5 + $0x148] sm:$0xf]  ;;  %v3962_v30 = vld [vmem:[#allocation5 + $0x354] sm:$0xf0] }
  0xb6   :  { %v240_v1 = vmul.f32 %v232_v57, %v160_v32  ;;  %v239_v32 = vmul.f32 %v231_v13, %v4449_v29  ;;  %v2776_v29 = vld [vmem:[#allocation5 + $0x88] sm:$0xf]  ;;  %v3870_v57 = vld [vmem:[#allocation5 + $0x74] sm:$0xf0]  ;;  %v3916_v40 = vld [vmem:[#allocation5 + $0x1ec] sm:$0xf] }
  0xb7   :  { %v4169_v2 = vpop.eup %4168  ;;  %v241_v4 = vmul.f32 %v233_v61, %v174_v33  ;;  %v3177_v61 = vor.u32 %v3974_v54, %v3176_v53  ;;  %v2712_v31 = vld [vmem:[#allocation5 + $0x8] sm:$0xf]  ;;  %v3890_v35 = vld [vmem:[#allocation5 + $0x114] sm:$0xf0]  ;;  %v3912_v53 = vld [vmem:[#allocation5 + $0x1cc] sm:$0xf] }
  0xb8   :  { %v4171_v6 = vpop.eup %4170  ;;  %v4454_v8 = vpack.c.bf16 %v240_v1, %v236_v0  ;;  %v226_v9 = vadd.f32 1.0, %v4169_v2  ;;  %v2761_v0 = vor.u32 %v3870_v57, %v2760_v56  ;;  %v3160_v1 = vld [vmem:[#allocation5 + $0x388] sm:$0xf]  ;;  %v3970_v2 = vld [vmem:[#allocation5 + $0x394] sm:$0xf0] }
  0xb9   :  { %v4456_v16 = vpack.c.bf16 %v241_v4, %v237_v3  ;;  %v227_v17 = vadd.f32 1.0, %v4171_v6  ;;  %v2889_v3 = vor.u32 %v3902_v60, %v2888_v59  ;;  %v2744_v4 = vld [vmem:[#allocation5 + $0x48] sm:$0xf]  ;;  %v3033_v6 = vor.u32 %v3938_v63, %v3032_v62  ;;  %v2938_v54 = vld [vmem:[#allocation5 + $0x1d8] sm:$0xf0] }
  0xba   :  { %v234_v19 = vmul.f32 0.5, %v226_v9  ;;  %1035 = vmatmul.bf16.vlgmr.msrb.gmra.mxu0 %v4454_v8  ;;  %v3898_v9 = vld [vmem:[#allocation5 + $0x154] sm:$0xf0]  ;;  %v2968_v56 = vld [vmem:[#allocation5 + $0x208] sm:$0xf] }
  0xbb   :  { %v235_v21 = vmul.f32 0.5, %v227_v17  ;;  %1049 = vmatmul.bf16.vlgmr.msrb.gmra.mxu1 %v4456_v16  ;;  %1139 = vmatpush.bf16.msrb.mxu0 %v2825_v5  ;;  %v3866_v5 = vld [vmem:[#allocation5 + $0x54] sm:$0xf0]  ;;  %v3144_v17 = vld [vmem:[#allocation5 + $0x368] sm:$0xf]  ;;  %v2873_v14 = vor.u32 %v3898_v9, %v2872_v7 }
  0xbc   :  { %v242_v26 = vmul.f32 %v234_v19, %v188_v42  ;;  %1153 = vmatpush.bf16.msrb.mxu1 %v2953_v10  ;;  %v3192_v42 = vld [vmem:[#allocation5 + $0x3c8] sm:$0xf]  ;;  %v3161_v10 = vor.u32 %v3970_v2, %v3160_v1  ;;  %v2745_v13 = vor.u32 %v3866_v5, %v2744_v4  ;;  %v3145_v23 = vor.u32 %v3966_v18, %v3144_v17  ;;  %v3922_v57 = vld [vmem:[#allocation5 + $0x214] sm:$0xf0]  ;;  %v3948_v60 = vld [vmem:[#allocation5 + $0x2ec] sm:$0xf] }
  0xbd   :  { %v243_v33 = vmul.f32 %v235_v21, %v202_v43  ;;  %v3874_v43 = vld [vmem:[#allocation5 + $0x94] sm:$0xf0]  ;;  %v3193_v49 = vor.u32 %v3978_v44, %v3192_v42  ;;  %v2728_v19 = vld [vmem:[#allocation5 + $0x28] sm:$0xf]  ;;  %v2954_v42 = vld [vmem:[#allocation5 + $0x1f8] sm:$0xf0]  ;;  %v2941_v1 = vor.u32 %v3912_v53, %v2938_v54  ;;  %v2969_v2 = vor.u32 %v3922_v57, %v2968_v56 }
  0xbe   :  { %v4462_v37 = vpack.c.bf16 %v242_v26, %v238_v25  ;;  %v2777_v52 = vor.u32 %v3874_v43, %v2776_v29  ;;  %v2856_v21 = vld [vmem:[#allocation5 + $0x128] sm:$0xf]  ;;  %v3930_v25 = vld [vmem:[#allocation5 + $0x254] sm:$0xf0]  ;;  %v2729_v26 = vor.u32 %v3862_v15, %v2728_v19  ;;  %v2957_v50 = vor.u32 %v3916_v40, %v2954_v42  ;;  %v3980_v63 = vld [vmem:[#allocation5 + $0x3ec] sm:$0xf] }
  0xbf   :  { %v4464_v41 = vpack.c.bf16 %v243_v33, %v239_v32  ;;  %1140 = vmatpush.bf16.msrb.mxu0 %v2809_v22  ;;  %v3894_v22 = vld [vmem:[#allocation5 + $0x134] sm:$0xf0]  ;;  %v3001_v36 = vor.u32 %v3930_v25, %v3000_v24  ;;  %v2984_v44 = vld [vmem:[#allocation5 + $0x228] sm:$0xf]  ;;  %v2794_v4 = vld [vmem:[#allocation5 + $0xb8] sm:$0xf0] }
  0xc0   :  { %1154 = vmatpush.bf16.msrb.mxu1 %v2937_v27  ;;  %1063 = vmatmul.bf16.vlgmr.msrb.gmra.mxu2 %v4462_v37  ;;  %v3128_v27 = vld [vmem:[#allocation5 + $0x348] sm:$0xf]  ;;  %v2857_v32 = vor.u32 %v3894_v22, %v2856_v21  ;;  %v3858_v33 = vld [vmem:[#allocation5 + $0x14] sm:$0xf0]  ;;  %v3908_v7 = vld [vmem:[#allocation5 + $0x1ac] sm:$0xf] }
  0xc1   :  { %1077 = vmatmul.bf16.vlgmr.msrb.gmra.mxu3 %v4464_v41  ;;  %1167 = vmatpush.bf16.msrb.mxu2 %v3081_v34  ;;  %v2840_v34 = vld [vmem:[#allocation5 + $0x108] sm:$0xf]  ;;  %v2713_v29 = vor.u32 %v3858_v33, %v2712_v31  ;;  %v3954_v59 = vld [vmem:[#allocation5 + $0x314] sm:$0xf0]  ;;  %v2922_v9 = vld [vmem:[#allocation5 + $0x1b8] sm:$0xf0] }
  0xc2   :  { %1181 = vmatpush.bf16.msrb.mxu3 %v3209_v38  ;;  %v3884_v38 = vld [vmem:[#allocation5 + $0xec] sm:$0xf]  ;;  %v3112_v43 = vld [vmem:[#allocation5 + $0x328] sm:$0xf]  ;;  %v2841_v47 = vor.u32 %v3890_v35, %v2840_v34  ;;  %v3066_v12 = vld [vmem:[#allocation5 + $0x2d8] sm:$0xf0] }
  0xc3   :  { %1141 = vmatpush.bf16.msrb.mxu0 %v2793_v28  ;;  %v3129_v28 = vor.u32 %v3962_v30, %v3128_v27  ;;  %v2829_v48 = vor.u32 %v3884_v38, %v2826_v39  ;;  %v3976_v17 = vld [vmem:[#allocation5 + $0x3cc] sm:$0xf]  ;;  %v3194_v18 = vld [vmem:[#allocation5 + $0x3d8] sm:$0xf0] }
  0xc4   :  { %1155 = vmatpush.bf16.msrb.mxu1 %v2921_v45  ;;  %v3926_v45 = vld [vmem:[#allocation5 + $0x234] sm:$0xf0]  ;;  %v3872_v19 = vld [vmem:[#allocation5 + $0x8c] sm:$0xf]  ;;  %v2778_v15 = vld [vmem:[#allocation5 + $0x98] sm:$0xf0] }
  0xc5   :  { %1168 = vmatpush.bf16.msrb.mxu2 %v3065_v46  ;;  %v3958_v46 = vld [vmem:[#allocation5 + $0x334] sm:$0xf0]  ;;  %v2985_v51 = vor.u32 %v3926_v45, %v2984_v44  ;;  %v3904_v21 = vld [vmem:[#allocation5 + $0x18c] sm:$0xf]  ;;  %v2906_v22 = vld [vmem:[#allocation5 + $0x198] sm:$0xf0] }
  0xc6   :  { %1182 = vmatpush.bf16.msrb.mxu3 %v3193_v49  ;;  %v3880_v49 = vld [vmem:[#allocation5 + $0xcc] sm:$0xf]  ;;  %v3050_v25 = vld [vmem:[#allocation5 + $0x2b8] sm:$0xf0]  ;;  %v2909_v31 = vor.u32 %v3904_v21, %v2906_v22  ;;  %v3312_v22 = vld [vmem:[#allocation7 + $0xc0] sm:$0xf] }
  0xc7   :  { %1142 = vmatpush.bf16.msrb.mxu0 %v2777_v52  ;;  %v2810_v52 = vld [vmem:[#allocation5 + $0xd8] sm:$0xf0]  ;;  %v3940_v24 = vld [vmem:[#allocation5 + $0x2ac] sm:$0xf] }
  0xc8   :  { %1156 = vmatpush.bf16.msrb.mxu1 %v2905_v55  ;;  %v3113_v55 = vor.u32 %v3958_v46, %v3112_v43  ;;  %v2813_v62 = vor.u32 %v3880_v49, %v2810_v52  ;;  %v3972_v27 = vld [vmem:[#allocation5 + $0x3ac] sm:$0xf]  ;;  %v3178_v30 = vld [vmem:[#allocation5 + $0x3b8] sm:$0xf0]  ;;  %v3053_v34 = vor.u32 %v3940_v24, %v3050_v25 }
  0xc9   :  { %1169 = vmatpush.bf16.msrb.mxu2 %v3049_v58  ;;  %v3096_v58 = vld [vmem:[#allocation5 + $0x308] sm:$0xf]  ;;  %v2762_v33 = vld [vmem:[#allocation5 + $0x78] sm:$0xf0]  ;;  %v3900_v35 = vld [vmem:[#allocation5 + $0x16c] sm:$0xf]  ;;  %v3181_v38 = vor.u32 %v3972_v27, %v3178_v30 }
  0xca   :  { %1183 = vmatpush.bf16.msrb.mxu3 %v3177_v61  ;;  %1091 = vmatmul.bf16.vlgmr.msra.gmra.mxu0 %v4454_v8  ;;  %v3082_v61 = vld [vmem:[#allocation5 + $0x2f8] sm:$0xf0]  ;;  %v3097_v5 = vor.u32 %v3954_v59, %v3096_v58  ;;  %v3936_v39 = vld [vmem:[#allocation5 + $0x28c] sm:$0xf] }
  0xcb   :  { %1105 = vmatmul.bf16.vlgmr.msra.gmra.mxu1 %v4456_v16  ;;  %1143 = vmatpush.bf16.msrb.mxu0 %v2761_v0  ;;  %v3210_v0 = vld [vmem:[#allocation5 + $0x3f8] sm:$0xf0]  ;;  %v3968_v42 = vld [vmem:[#allocation5 + $0x38c] sm:$0xf] }
  0xcc   :  { %1157 = vmatpush.bf16.msrb.mxu1 %v2889_v3  ;;  %v3876_v3 = vld [vmem:[#allocation5 + $0xac] sm:$0xf]  ;;  %v3034_v40 = vld [vmem:[#allocation5 + $0x298] sm:$0xf0] }
  0xcd   :  { %1170 = vmatpush.bf16.msrb.mxu2 %v3033_v6  ;;  %v3085_v6 = vor.u32 %v3948_v60, %v3082_v61  ;;  %v3162_v44 = vld [vmem:[#allocation5 + $0x398] sm:$0xf0]  ;;  %v3037_v46 = vor.u32 %v3936_v39, %v3034_v40  ;;  %v3964_v53 = vld [vmem:[#allocation5 + $0x36c] sm:$0xf]  ;;  %v4001_v39 = vld [vmem:[#allocation7 + $0x8c] sm:$0xf0] }
  0xce   :  { %1184 = vmatpush.bf16.msrb.mxu3 %v3161_v10  ;;  %v3213_v10 = vor.u32 %v3980_v63, %v3210_v0  ;;  %v2746_v43 = vld [vmem:[#allocation5 + $0x58] sm:$0xf0]  ;;  %v3165_v49 = vor.u32 %v3968_v42, %v3162_v44  ;;  %v3860_v56 = vld [vmem:[#allocation5 + $0x2c] sm:$0xf]  ;;  %v3997_v42 = vld [vmem:[#allocation7 + $0x6c] sm:$0xf0] }
  0xcf   :  { %1144 = vmatpush.bf16.msrb.mxu0 %v2745_v13  ;;  %v2797_v13 = vor.u32 %v3876_v3, %v2794_v4  ;;  %v3146_v54 = vld [vmem:[#allocation5 + $0x378] sm:$0xf0]  ;;  %v3892_v59 = vld [vmem:[#allocation5 + $0x12c] sm:$0xf]  ;;  %v3456_v44 = vld [vmem:[#allocation7 + $0x1e0] sm:$0xf] }
  0xd0   :  { %1158 = vmatpush.bf16.msrb.mxu1 %v2873_v14  ;;  %1119 = vmatmul.bf16.vlgmr.msra.gmra.mxu2 %v4462_v37  ;;  %v2925_v14 = vor.u32 %v3908_v7, %v2922_v9  ;;  %v2730_v57 = vld [vmem:[#allocation5 + $0x38] sm:$0xf0]  ;;  %v3149_v61 = vor.u32 %v3964_v53, %v3146_v54  ;;  %v3856_v4 = vld [vmem:[#allocation5 + $0xc] sm:$0xf]  ;;  %v3216_v54 = vld [vmem:[#allocation7] sm:$0xf] }
  0xd1   :  { %1133 = vmatmul.bf16.vlgmr.msra.gmra.mxu3 %v4464_v41  ;;  %1171 = vmatpush.bf16.msrb.mxu2 %v3017_v20  ;;  %v3069_v20 = vor.u32 %v3944_v11, %v3066_v12  ;;  %v2858_v60 = vld [vmem:[#allocation5 + $0x138] sm:$0xf0]  ;;  %v2733_v0 = vor.u32 %v3860_v56, %v2730_v57  ;;  %v4013_v11 = vld [vmem:[#allocation7 + $0xec] sm:$0xf0]  ;;  %v3920_v25 = vld [vmem:[#allocation5 + $0x20c] sm:$0xf] }
  0xd2   :  { %1185 = vmatpush.bf16.msrb.mxu3 %v3145_v23  ;;  %v3197_v23 = vor.u32 %v3976_v17, %v3194_v18  ;;  %v3002_v63 = vld [vmem:[#allocation5 + $0x258] sm:$0xf0]  ;;  %v2861_v3 = vor.u32 %v3892_v59, %v2858_v60  ;;  %v3952_v27 = vld [vmem:[#allocation5 + $0x30c] sm:$0xf]  ;;  %v3408_v56 = vld [vmem:[#allocation7 + $0x180] sm:$0xf] }
  0xd3   :  { %1145 = vmatpush.bf16.msrb.mxu0 %v2729_v26  ;;  %v2781_v26 = vor.u32 %v3872_v19, %v2778_v15  ;;  %v2842_v9 = vld [vmem:[#allocation5 + $0x118] sm:$0xf0]  ;;  %v4011_v59 = vld [vmem:[#allocation7 + $0xe4] sm:$0xf]  ;;  %v3330_v60 = vld [vmem:[#allocation7 + $0xf0] sm:$0xf0] }
  0xd4   :  { %1159 = vmatpush.bf16.msrb.mxu1 %v2857_v32  ;;  %v3868_v32 = vld [vmem:[#allocation5 + $0x6c] sm:$0xf]  ;;  %v2986_v17 = vld [vmem:[#allocation5 + $0x238] sm:$0xf0] }
  0xd5   :  { %1172 = vmatpush.bf16.msrb.mxu2 %v3001_v36  ;;  %v2890_v36 = vld [vmem:[#allocation5 + $0x178] sm:$0xf0] }
  0xd6   :  { %1186 = vmatpush.bf16.msrb.mxu3 %v3129_v28  ;;  %v2765_v28 = vor.u32 %v3868_v32, %v2762_v33  ;;  %v2893_v45 = vor.u32 %v3900_v35, %v2890_v36  ;;  %v3114_v19 = vld [vmem:[#allocation5 + $0x338] sm:$0xf0]  ;;  %v3296_v33 = vld [vmem:[#allocation7 + $0xa0] sm:$0xf] }
  0xd7   :  { %1146 = vmatpush.bf16.msrb.mxu0 %v2713_v29  ;;  %v3864_v29 = vld [vmem:[#allocation5 + $0x4c] sm:$0xf]  ;;  %v3098_v30 = vld [vmem:[#allocation5 + $0x318] sm:$0xf0] }
  0xd8   :  { %1160 = vmatpush.bf16.msrb.mxu1 %v2841_v47  ;;  %v3896_v47 = vld [vmem:[#allocation5 + $0x14c] sm:$0xf]  ;;  %v2749_v52 = vor.u32 %v3864_v29, %v2746_v43  ;;  %v3101_v35 = vor.u32 %v3952_v27, %v3098_v30  ;;  %v3993_v43 = vld [vmem:[#allocation7 + $0x4c] sm:$0xf0]  ;;  %v3344_v30 = vld [vmem:[#allocation7 + $0x100] sm:$0xf] }
  0xd9   :  { %1173 = vmatpush.bf16.msrb.mxu2 %v2985_v51  ;;  %v3018_v51 = vld [vmem:[#allocation5 + $0x278] sm:$0xf0] }
  0xda   :  { %1187 = vmatpush.bf16.msrb.mxu3 %v3113_v55  ;;  %1147 = vmatmul.bf16.vlgmr.msrb.gmra.mxu0 %v4454_v8 }
  0xdb   :  { %1195 = vmatpush.bf16.msra.mxu0 %v2829_v48  ;;  %1161 = vmatmul.bf16.vlgmr.msrb.gmra.mxu1 %v4456_v16  ;;  %v2874_v48 = vld [vmem:[#allocation5 + $0x158] sm:$0xf0] }
  0xdc   :  { %1209 = vmatpush.bf16.msra.mxu1 %v2957_v50  ;;  %v3932_v50 = vld [vmem:[#allocation5 + $0x26c] sm:$0xf]  ;;  %v2877_v55 = vor.u32 %v3896_v47, %v2874_v48  ;;  %v4041_v48 = vld [vmem:[#allocation7 + $0x1cc] sm:$0xf0] }
  0xdd   :  { %1174 = vmatpush.bf16.msrb.mxu2 %v2969_v2  ;;  %v3021_v58 = vor.u32 %v3932_v50, %v3018_v51  ;;  %v3130_v2 = vld [vmem:[#allocation5 + $0x358] sm:$0xf0]  ;;  %v3989_v50 = vld [vmem:[#allocation7 + $0x2c] sm:$0xf0] }
  0xde   :  { %1188 = vmatpush.bf16.msrb.mxu3 %v3097_v5  ;;  %v2714_v5 = vld [vmem:[#allocation5 + $0x18] sm:$0xf0] }
  0xdf   :  { %1196 = vmatpush.bf16.msra.mxu0 %v2813_v62  ;;  %v3928_v62 = vld [vmem:[#allocation5 + $0x24c] sm:$0xf]  ;;  %v2717_v18 = vor.u32 %v3856_v4, %v2714_v5  ;;  %v4007_v4 = vld [vmem:[#allocation7 + $0xc4] sm:$0xf]  ;;  %v3314_v5 = vld [vmem:[#allocation7 + $0xd0] sm:$0xf0] }
  0xe0   :  { %1210 = vmatpush.bf16.msra.mxu1 %v2941_v1  ;;  %1175 = vmatmul.bf16.vlgmr.msrb.gmra.mxu2 %v4462_v37  ;;  %v3960_v1 = vld [vmem:[#allocation5 + $0x34c] sm:$0xf]  ;;  %v3005_v7 = vor.u32 %v3928_v62, %v3002_v63  ;;  %v3333_v62 = vor.u32 %v4011_v59, %v3330_v60  ;;  %v3392_v63 = vld [vmem:[#allocation7 + $0x160] sm:$0xf] }
  0xe1   :  { %1223 = vmatpush.bf16.msra.mxu2 %v3085_v6  ;;  %1189 = vmatmul.bf16.vlgmr.msrb.gmra.mxu3 %v4464_v41  ;;  %v3888_v6 = vld [vmem:[#allocation5 + $0x10c] sm:$0xf]  ;;  %v3133_v12 = vor.u32 %v3960_v1, %v3130_v2  ;;  %v3584_v1 = vld [vmem:[#allocation7 + $0x2e0] sm:$0xf] }
  0xe2   :  { %1237 = vmatpush.bf16.msra.mxu3 %v3213_v10  ;;  %v3328_v10 = vld [vmem:[#allocation7 + $0xe0] sm:$0xf]  ;;  %v2845_v15 = vor.u32 %v3888_v6, %v2842_v9 }
  0xe3   :  { %1197 = vmatpush.bf16.msra.mxu0 %v2797_v13  ;;  %v3924_v13 = vld [vmem:[#allocation5 + $0x22c] sm:$0xf]  ;;  %v3376_v9 = vld [vmem:[#allocation7 + $0x140] sm:$0xf] }
  0xe4   :  { %1211 = vmatpush.bf16.msra.mxu1 %v2925_v14  ;;  %v3956_v14 = vld [vmem:[#allocation5 + $0x32c] sm:$0xf]  ;;  %v2989_v21 = vor.u32 %v3924_v13, %v2986_v17  ;;  %v4073_v13 = vld [vmem:[#allocation7 + $0x2cc] sm:$0xf0]  ;;  %v4003_v17 = vld [vmem:[#allocation7 + $0xa4] sm:$0xf] }
  0xe5   :  { %1224 = vmatpush.bf16.msra.mxu2 %v3069_v20  ;;  %v3329_v20 = vor.u32 %v4013_v11, %v3328_v10  ;;  %v3117_v24 = vor.u32 %v3956_v14, %v3114_v19  ;;  %v4025_v10 = vld [vmem:[#allocation7 + $0x14c] sm:$0xf0]  ;;  %v3568_v11 = vld [vmem:[#allocation7 + $0x2c0] sm:$0xf] }
  0xe6   :  { %1238 = vmatpush.bf16.msra.mxu3 %v3197_v23  ;;  %v4009_v23 = vld [vmem:[#allocation7 + $0xcc] sm:$0xf0]  ;;  %v3569_v14 = vor.u32 %v4073_v13, %v3568_v11 }
  0xe7   :  { %1198 = vmatpush.bf16.msra.mxu0 %v2781_v26  ;;  %v2970_v26 = vld [vmem:[#allocation5 + $0x218] sm:$0xf0]  ;;  %v4049_v11 = vld [vmem:[#allocation7 + $0x20c] sm:$0xf0] }
  0xe8   :  { %1212 = vmatpush.bf16.msra.mxu1 %v2909_v31  ;;  %v3313_v31 = vor.u32 %v4009_v23, %v3312_v22  ;;  %v2973_v32 = vor.u32 %v3920_v25, %v2970_v26  ;;  %v4069_v23 = vld [vmem:[#allocation7 + $0x2ac] sm:$0xf0]  ;;  %v3282_v25 = vld [vmem:[#allocation7 + $0x90] sm:$0xf0] }
  0xe9   :  { %1225 = vmatpush.bf16.msra.mxu2 %v3053_v34  ;;  %v4005_v34 = vld [vmem:[#allocation7 + $0xac] sm:$0xf0] }
  0xea   :  { %1239 = vmatpush.bf16.msra.mxu3 %v3181_v38  ;;  %v3297_v36 = vor.u32 %v4005_v34, %v3296_v33  ;;  %v3280_v38 = vld [vmem:[#allocation7 + $0x80] sm:$0xf]  ;;  %v4065_v34 = vld [vmem:[#allocation7 + $0x28c] sm:$0xf0] }
  0xeb   :  { %1199 = vmatpush.bf16.msra.mxu0 %v2765_v28  ;;  %v3281_v40 = vor.u32 %v4001_v39, %v3280_v38  ;;  %v3264_v28 = vld [vmem:[#allocation7 + $0x60] sm:$0xf] }
  0xec   :  { %1213 = vmatpush.bf16.msra.mxu1 %v2893_v45  ;;  %v4045_v45 = vld [vmem:[#allocation7 + $0x1ec] sm:$0xf0] }
  0xed   :  { %1226 = vmatpush.bf16.msra.mxu2 %v3037_v46  ;;  %v3457_v29 = vor.u32 %v4045_v45, %v3456_v44  ;;  %v3440_v46 = vld [vmem:[#allocation7 + $0x1c0] sm:$0xf]  ;;  %v4061_v45 = vld [vmem:[#allocation7 + $0x26c] sm:$0xf0] }
  0xee   :  { %1240 = vmatpush.bf16.msra.mxu3 %v3165_v49  ;;  %v3441_v49 = vor.u32 %v4041_v48, %v3440_v46  ;;  %v3250_v46 = vld [vmem:[#allocation7 + $0x50] sm:$0xf0] }
  0xef   :  { %1200 = vmatpush.bf16.msra.mxu0 %v2749_v52  ;;  %v4037_v52 = vld [vmem:[#allocation7 + $0x1ac] sm:$0xf0] }
  0xf0   :  { %1214 = vmatpush.bf16.msra.mxu1 %v2877_v55  ;;  %v3985_v55 = vld [vmem:[#allocation7 + $0xc] sm:$0xf0] }
  0xf1   :  { %1227 = vmatpush.bf16.msra.mxu2 %v3021_v58  ;;  %v3217_v57 = vor.u32 %v3985_v55, %v3216_v54  ;;  %v4033_v58 = vld [vmem:[#allocation7 + $0x18c] sm:$0xf0]  ;;  %v3987_v54 = vld [vmem:[#allocation7 + $0x24] sm:$0xf]  ;;  %v3234_v55 = vld [vmem:[#allocation7 + $0x30] sm:$0xf0] }
  0xf2   :  { %1241 = vmatpush.bf16.msra.mxu3 %v3149_v61  ;;  %v3409_v61 = vor.u32 %v4033_v58, %v3408_v56  ;;  %v4035_v56 = vld [vmem:[#allocation7 + $0x1a4] sm:$0xf]  ;;  %v3426_v58 = vld [vmem:[#allocation7 + $0x1b0] sm:$0xf0] }
  0xf3   :  { %1201 = vmatpush.bf16.msra.mxu0 %v2733_v0  ;;  %v4029_v0 = vld [vmem:[#allocation7 + $0x16c] sm:$0xf0]  ;;  %v3429_v59 = vor.u32 %v4035_v56, %v3426_v58 }
  0xf4   :  { %1215 = vmatpush.bf16.msra.mxu1 %v2861_v3  ;;  %v3393_v2 = vor.u32 %v4029_v0, %v3392_v63  ;;  %v4077_v3 = vld [vmem:[#allocation7 + $0x2ec] sm:$0xf0] }
  0xf5   :  { %1228 = vmatpush.bf16.msra.mxu2 %v3005_v7  ;;  %v3585_v6 = vor.u32 %v4077_v3, %v3584_v1  ;;  %v3317_v7 = vor.u32 %v4007_v4, %v3314_v5  ;;  %v3983_v1 = vld [vmem:[#allocation7 + $0x4] sm:$0xf]  ;;  %v3410_v5 = vld [vmem:[#allocation7 + $0x190] sm:$0xf0]  ;;  %v4097_v56 = vld [vmem:[#allocation7 + $0x38c] sm:$0xf0] }
  0xf6   :  { %1242 = vmatpush.bf16.msra.mxu3 %v3133_v12  ;;  %v3377_v12 = vor.u32 %v4025_v10, %v3376_v9  ;;  %v4031_v3 = vld [vmem:[#allocation7 + $0x184] sm:$0xf]  ;;  %v3472_v10 = vld [vmem:[#allocation7 + $0x200] sm:$0xf] }
  0xf7   :  { %1202 = vmatpush.bf16.msra.mxu0 %v2717_v18  ;;  %v3298_v18 = vld [vmem:[#allocation7 + $0xb0] sm:$0xf0] }
  0xf8   :  { %1216 = vmatpush.bf16.msra.mxu1 %v2845_v15  ;;  %v3301_v19 = vor.u32 %v4003_v17, %v3298_v18  ;;  %v3360_v15 = vld [vmem:[#allocation7 + $0x120] sm:$0xf]  ;;  %v3473_v17 = vor.u32 %v4049_v11, %v3472_v10  ;;  %v4109_v18 = vld [vmem:[#allocation7 + $0x3ec] sm:$0xf0]  ;;  %v3522_v10 = vld [vmem:[#allocation7 + $0x270] sm:$0xf0] }
  0xf9   :  { %1229 = vmatpush.bf16.msra.mxu2 %v2989_v21  ;;  %v3552_v21 = vld [vmem:[#allocation7 + $0x2a0] sm:$0xf] }
  0xfa   :  { %1243 = vmatpush.bf16.msra.mxu3 %v3117_v24  ;;  %1203 = vmatmul.bf16.vlgmr.msra.gmra.mxu0 %v4454_v8  ;;  %v3265_v8 = vor.u32 %v3997_v42, %v3264_v28  ;;  %v3999_v24 = vld [vmem:[#allocation7 + $0x84] sm:$0xf]  ;;  %v3553_v26 = vor.u32 %v4069_v23, %v3552_v21  ;;  %v3458_v28 = vld [vmem:[#allocation7 + $0x1f0] sm:$0xf0] }
  0xfb   :  { %2074 = vmatpush.bf16.msrb.mxu0 %v3329_v20  ;;  %1217 = vmatmul.bf16.vlgmr.msra.gmra.mxu1 %v4456_v16  ;;  %v3248_v16 = vld [vmem:[#allocation7 + $0x40] sm:$0xf]  ;;  %v4021_v20 = vld [vmem:[#allocation7 + $0x12c] sm:$0xf0]  ;;  %v3285_v27 = vor.u32 %v3999_v24, %v3282_v25  ;;  %v4075_v23 = vld [vmem:[#allocation7 + $0x2e4] sm:$0xf] }
  0xfc   :  { %2088 = vmatpush.bf16.msrb.mxu1 %v3457_v29  ;;  %v3249_v47 = vor.u32 %v3993_v43, %v3248_v16  ;;  %v3361_v22 = vor.u32 %v4021_v20, %v3360_v15  ;;  %v4480_v42 = vld [vmem:[#allocation8 + $0x1] ss:$4 sm:$0xf]  ;;  %v3586_v24 = vld [vmem:[#allocation7 + $0x2f0] sm:$0xf0] }
  0xfd   :  { %1230 = vmatpush.bf16.msra.mxu2 %v2973_v32  ;;  %v3536_v32 = vld [vmem:[#allocation7 + $0x280] sm:$0xf]  ;;  %v3991_v43 = vld [vmem:[#allocation7 + $0x44] sm:$0xf]  ;;  %v3589_v25 = vor.u32 %v4075_v23, %v3586_v24  ;;  %v3506_v23 = vld [vmem:[#allocation7 + $0x250] sm:$0xf0] }
  0xfe   :  { %1244 = vmatpush.bf16.msra.mxu3 %v3101_v35  ;;  %v3995_v35 = vld [vmem:[#allocation7 + $0x64] sm:$0xf]  ;;  %v3537_v38 = vor.u32 %v4065_v34, %v3536_v32 }
  0xff   :  { %2075 = vmatpush.bf16.msrb.mxu0 %v3313_v31  ;;  %v4017_v31 = vld [vmem:[#allocation7 + $0x10c] sm:$0xf0]  ;;  %v4023_v34 = vld [vmem:[#allocation7 + $0x144] sm:$0xf] }
 0x100   :  { %1231 = vmatmul.bf16.vlgmr.msra.gmra.mxu2 %v4462_v37  ;;  %2089 = vmatpush.bf16.msrb.mxu1 %v3441_v49  ;;  %v3232_v37 = vld [vmem:[#allocation7 + $0x20] sm:$0xf]  ;;  %v3345_v33 = vor.u32 %v4017_v31, %v3344_v30  ;;  %v3253_v49 = vor.u32 %v3991_v43, %v3250_v46  ;;  %v4105_v31 = vld [vmem:[#allocation7 + $0x3cc] sm:$0xf0] }
 0x101   :  { %1245 = vmatmul.bf16.vlgmr.msra.gmra.mxu3 %v4464_v41  ;;  %v3424_v41 = vld [vmem:[#allocation7 + $0x1a0] sm:$0xf]  ;;  %v3233_v51 = vor.u32 %v3989_v50, %v3232_v37  ;;  %2102 = vmatpush.bf16.msrb.mxu2 %v3585_v6  ;;  %v3442_v37 = vld [vmem:[#allocation7 + $0x1d0] sm:$0xf0] }
 0x102   :  { %v3425_v53 = vor.u32 %v4037_v52, %v3424_v41  ;;  %v379_v41 = vperm.slane %v4480_v42, 0  ;;  %v4057_v52 = vld [vmem:[#allocation7 + $0x24c] sm:$0xf0]  ;;  %v3696_v30 = vld [vmem:[#allocation7 + $0x3c0] sm:$0xf] }
 0x103   :  { %2076 = vmatpush.bf16.msrb.mxu0 %v3297_v36  ;;  %v3266_v36 = vld [vmem:[#allocation7 + $0x70] sm:$0xf0] }
 0x104   :  { %2090 = vmatpush.bf16.msrb.mxu1 %v3425_v53  ;;  %v3269_v39 = vor.u32 %v3995_v35, %v3266_v36  ;;  %v3378_v35 = vld [vmem:[#allocation7 + $0x150] sm:$0xf0]  ;;  %v4071_v36 = vld [vmem:[#allocation7 + $0x2c4] sm:$0xf] }
 0x105   :  { %2103 = vmatpush.bf16.msrb.mxu2 %v3569_v14  ;;  %v4027_v14 = vld [vmem:[#allocation7 + $0x164] sm:$0xf] }
 0x107   :  { %2077 = vmatpush.bf16.msrb.mxu0 %v3281_v40  ;;  %v4043_v40 = vld [vmem:[#allocation7 + $0x1e4] sm:$0xf] }
 0x108   :  { %2091 = vmatpush.bf16.msrb.mxu1 %v3409_v61  ;;  %v3461_v44 = vor.u32 %v4043_v40, %v3458_v28  ;;  %v3488_v61 = vld [vmem:[#allocation7 + $0x220] sm:$0xf]  ;;  %v3570_v40 = vld [vmem:[#allocation7 + $0x2d0] sm:$0xf0] }
 0x109   :  { %2104 = vmatpush.bf16.msrb.mxu2 %v3553_v26  ;;  %v3573_v28 = vor.u32 %v4071_v36, %v3570_v40  ;;  %v4014_v36 = vld [vmem:[#allocation7 + $0xf4] sm:$0xf0] }
 0x10b   :  { %2078 = vmatpush.bf16.msrb.mxu0 %v3265_v8  ;;  %v3520_v8 = vld [vmem:[#allocation7 + $0x260] sm:$0xf] }
 0x10c   :  { %2092 = vmatpush.bf16.msrb.mxu1 %v3393_v2  ;;  %v3521_v16 = vor.u32 %v4061_v45, %v3520_v8  ;;  %v3218_v2 = vld [vmem:[#allocation7 + $0x10] sm:$0xf0]  ;;  %v380_v8 = vperm.slane %v4480_v42, 1  ;;  %v3680_v45 = vld [vmem:[#allocation7 + $0x3a0] sm:$0xf] }
 0x10d   :  { %2105 = vmatpush.bf16.msrb.mxu2 %v3537_v38  ;;  %v3221_v4 = vor.u32 %v3983_v1, %v3218_v2 }
 0x10f   :  { %2079 = vmatpush.bf16.msrb.mxu0 %v3249_v47  ;;  %v4039_v47 = vld [vmem:[#allocation7 + $0x1c4] sm:$0xf] }
 0x110   :  { %2093 = vmatpush.bf16.msrb.mxu1 %v3377_v12  ;;  %v3445_v50 = vor.u32 %v4039_v47, %v3442_v37  ;;  %v3712_v12 = vld [vmem:[#allocation7 + $0x3e0] sm:$0xf]  ;;  %v4019_v47 = vld [vmem:[#allocation7 + $0x124] sm:$0xf] }
 0x111   :  { %2106 = vmatpush.bf16.msrb.mxu2 %v3521_v16  ;;  %v3713_v21 = vor.u32 %v4109_v18, %v3712_v12 }
 0x113   :  { %2080 = vmatpush.bf16.msrb.mxu0 %v3233_v51  ;;  %v3504_v51 = vld [vmem:[#allocation7 + $0x240] sm:$0xf]  ;;  %2116 = vmatpush.bf16.msrb.mxu3 %v3713_v21 }
 0x114   :  { %2094 = vmatpush.bf16.msrb.mxu1 %v3361_v22  ;;  %v3505_v53 = vor.u32 %v4057_v52, %v3504_v51  ;;  %v3554_v51 = vld [vmem:[#allocation7 + $0x2b0] sm:$0xf0] }
 0x116   :  { %2107 = vmatpush.bf16.msrb.mxu2 %v3505_v53 }
 0x117   :  { %2081 = vmatpush.bf16.msrb.mxu0 %v3217_v57  ;;  %v3237_v57 = vor.u32 %v3987_v54, %v3234_v55  ;;  %v3664_v55 = vld [vmem:[#allocation7 + $0x380] sm:$0xf] }
 0x118   :  { %2095 = vmatpush.bf16.msrb.mxu1 %v3345_v33  ;;  %v3697_v33 = vor.u32 %v4105_v31, %v3696_v30  ;;  %v3665_v58 = vor.u32 %v4097_v56, %v3664_v55 }
 0x11a   :  { %2117 = vmatpush.bf16.msrb.mxu3 %v3697_v33 }
 0x11b   :  { %2130 = vmatpush.bf16.msra.mxu0 %v3333_v62  ;;  %v4053_v62 = vld [vmem:[#allocation7 + $0x22c] sm:$0xf0] }
 0x11c   :  { %2144 = vmatpush.bf16.msra.mxu1 %v3461_v44  ;;  %v3489_v0 = vor.u32 %v4053_v62, %v3488_v61  ;;  %v4063_v61 = vld [vmem:[#allocation7 + $0x284] sm:$0xf] }
 0x11e   :  { %2108 = vmatpush.bf16.msrb.mxu2 %v3489_v0  ;;  %v3538_v0 = vld [vmem:[#allocation7 + $0x290] sm:$0xf0] }
 0x11f   :  { %2131 = vmatpush.bf16.msra.mxu0 %v3317_v7  ;;  %v3413_v7 = vor.u32 %v4031_v3, %v3410_v5  ;;  %v3541_v1 = vor.u32 %v4063_v61, %v3538_v0  ;;  %v4093_v5 = vld [vmem:[#allocation7 + $0x36c] sm:$0xf0] }
 0x120   :  { %2145 = vmatpush.bf16.msra.mxu1 %v3445_v50 }
 0x122   :  { %2109 = vmatpush.bf16.msrb.mxu2 %v3473_v17 }
 0x123   :  { %2132 = vmatpush.bf16.msra.mxu0 %v3301_v19  ;;  %v3394_v19 = vld [vmem:[#allocation7 + $0x170] sm:$0xf0] }
 0x124   :  { %2146 = vmatpush.bf16.msra.mxu1 %v3429_v59  ;;  %v3397_v22 = vor.u32 %v4027_v14, %v3394_v19  ;;  %v4015_v59 = vld [vmem:[#allocation7 + $0x104] sm:$0xf] }
 0x126   :  { %2158 = vmatpush.bf16.msra.mxu2 %v3589_v25 }
 0x127   :  { %2133 = vmatpush.bf16.msra.mxu0 %v3285_v27 }
 0x128   :  { %2147 = vmatpush.bf16.msra.mxu1 %v3413_v7 }
 0x12a   :  { %2159 = vmatpush.bf16.msra.mxu2 %v3573_v28 }
 0x12b   :  { %2134 = vmatpush.bf16.msra.mxu0 %v3269_v39  ;;  %v3381_v39 = vor.u32 %v4023_v34, %v3378_v35  ;;  %v3336_v34 = vld [vmem:[#allocation7 + $0xe8] sm:$0xf] }
 0x12c   :  { %2148 = vmatpush.bf16.msra.mxu1 %v3397_v22  ;;  %v4055_v22 = vld [vmem:[#allocation7 + $0x244] sm:$0xf] }
 0x12f   :  { %2135 = vmatpush.bf16.msra.mxu0 %v3253_v49  ;;  %v4067_v49 = vld [vmem:[#allocation7 + $0x2a4] sm:$0xf] }
 0x130   :  { %2149 = vmatpush.bf16.msra.mxu1 %v3381_v39  ;;  %v3557_v52 = vor.u32 %v4067_v49, %v3554_v51  ;;  %v4085_v39 = vld [vmem:[#allocation7 + $0x32c] sm:$0xf0]  ;;  %v3600_v51 = vld [vmem:[#allocation7 + $0x300] sm:$0xf] }
 0x132   :  { %2160 = vmatpush.bf16.msra.mxu2 %v3557_v52  ;;  %v4081_v52 = vld [vmem:[#allocation7 + $0x30c] sm:$0xf0] }
 0x133   :  { %2136 = vmatpush.bf16.msra.mxu0 %v3237_v57  ;;  %v3601_v56 = vor.u32 %v4081_v52, %v3600_v51  ;;  %v4091_v51 = vld [vmem:[#allocation7 + $0x364] sm:$0xf]  ;;  %v3650_v52 = vld [vmem:[#allocation7 + $0x370] sm:$0xf0] }
 0x136   :  { %2161 = vmatpush.bf16.msra.mxu2 %v3541_v1  ;;  %v3304_v1 = vld [vmem:[#allocation7 + $0xa8] sm:$0xf] }
 0x137   :  { %v1036_v29 = vpop.f32.mrf.mxu0  ;;  %2137 = vmatpush.bf16.msra.mxu0 %v3221_v4  ;;  %v3648_v4 = vld [vmem:[#allocation7 + $0x360] sm:$0xf] }
 0x138   :  { %v1050_v48 = vpop.f32.mrf.mxu1  ;;  %v1037_v60 = vadd.f32 %v1036_v29, %v379_v41  ;;  %v4101_v29 = vld [vmem:[#allocation7 + $0x3ac] sm:$0xf0]  ;;  %v3649_v7 = vor.u32 %v4093_v5, %v3648_v4  ;;  %v4006_v4 = vld [vmem:[#allocation7 + $0xb4] sm:$0xf0]  ;;  %v4103_v5 = vld [vmem:[#allocation7 + $0x3c4] sm:$0xf] }
 0x139   :  { %v3681_v46 = vor.u32 %v4101_v29, %v3680_v45  ;;  %v3490_v45 = vld [vmem:[#allocation7 + $0x230] sm:$0xf0] }
 0x13a   :  { %v1051_v9 = vadd.f32 %v1050_v48, %v1037_v60  ;;  %v3362_v48 = vld [vmem:[#allocation7 + $0x130] sm:$0xf0] }
 0x13b   :  { %2118 = vmatpush.bf16.msrb.mxu3 %v3681_v46  ;;  %v3346_v60 = vld [vmem:[#allocation7 + $0x110] sm:$0xf0] }
 0x13f   :  { %v1038_v63 = vpop.f32.mrf.mxu0  ;;  %2119 = vmatpush.bf16.msrb.mxu3 %v3665_v58  ;;  %v3474_v58 = vld [vmem:[#allocation7 + $0x210] sm:$0xf0] }
 0x140   :  { %v1052_v6 = vpop.f32.mrf.mxu1  ;;  %v1039_v26 = vadd.f32 %v1038_v63, %v379_v41  ;;  %v3365_v41 = vor.u32 %v4019_v47, %v3362_v48  ;;  %v3349_v63 = vor.u32 %v4015_v59, %v3346_v60  ;;  %v3320_v48 = vld [vmem:[#allocation7 + $0xc8] sm:$0xf]  ;;  %v4107_v59 = vld [vmem:[#allocation7 + $0x3e4] sm:$0xf]  ;;  %v3714_v60 = vld [vmem:[#allocation7 + $0x3f0] sm:$0xf0] }
 0x141   :  { %v3717_v61 = vor.u32 %v4107_v59, %v3714_v60  ;;  %v3990_v59 = vld [vmem:[#allocation7 + $0x34] sm:$0xf0]  ;;  %v4087_v60 = vld [vmem:[#allocation7 + $0x344] sm:$0xf] }
 0x142   :  { %v1053_v44 = vadd.f32 %v1052_v6, %v1039_v26  ;;  %2150 = vmatpush.bf16.msra.mxu1 %v3365_v41  ;;  %v3509_v26 = vor.u32 %v4055_v22, %v3506_v23  ;;  %v4010_v41 = vld [vmem:[#allocation7 + $0xd4] sm:$0xf0] }
 0x143   :  { %v1064_v13 = vpop.f32.mrf.mxu2  ;;  %2120 = vmatpush.bf16.msrb.mxu3 %v3649_v7  ;;  %v3321_v0 = vor.u32 %v4010_v41, %v3320_v48  ;;  %v3994_v48 = vld [vmem:[#allocation7 + $0x54] sm:$0xf0] }
 0x144   :  { %v1065_v15 = vadd.f32 %v1064_v13, %v1051_v9  ;;  %v1078_v20 = vpop.f32.mrf.mxu3  ;;  %v4059_v9 = vld [vmem:[#allocation7 + $0x264] sm:$0xf]  ;;  %v4042_v41 = vld [vmem:[#allocation7 + $0x1d4] sm:$0xf0] }
 0x145   :  { %v3525_v13 = vor.u32 %v4059_v9, %v3522_v10 }
 0x146   :  { %v4483_v27 = vadd.f32 %v1078_v20, %v1065_v15  ;;  %2151 = vmatpush.bf16.msra.mxu1 %v3349_v63  ;;  %v3632_v15 = vld [vmem:[#allocation7 + $0x340] sm:$0xf]  ;;  %v4089_v20 = vld [vmem:[#allocation7 + $0x34c] sm:$0xf0] }
 0x147   :  { %v1092_v32 = vpop.f32.mrf.mxu0  ;;  %2162 = vmatpush.bf16.msra.mxu2 %v3525_v13  ;;  %v3633_v21 = vor.u32 %v4089_v20, %v3632_v15  ;;  %v4099_v15 = vld [vmem:[#allocation7 + $0x3a4] sm:$0xf]  ;;  %v3682_v20 = vld [vmem:[#allocation7 + $0x3b0] sm:$0xf0] }
 0x148   :  { %v1251_v38 = vmul.f32 0.5, %v4483_v27  ;;  %v1106_v16 = vpop.f32.mrf.mxu1  ;;  %v1093_v53 = vadd.f32 %v1092_v32, %v380_v8  ;;  %v381_v32 = vperm.slane %v4480_v42, 2  ;;  %v3685_v23 = vor.u32 %v4099_v15, %v3682_v20  ;;  %v3400_v20 = vld [vmem:[#allocation7 + $0x168] sm:$0xf] }
 0x149   :  { %2121 = vmatpush.bf16.msrb.mxu3 %v3633_v21 }
 0x14a   :  { %4172 = vtanh.f32 %v1251_v38  ;;  %v1107_v3 = vadd.f32 %v1106_v16, %v1093_v53  ;;  %v3616_v38 = vld [vmem:[#allocation7 + $0x320] sm:$0xf] }
 0x14b   :  { %v1066_v43 = vpop.f32.mrf.mxu2  ;;  %2163 = vmatpush.bf16.msra.mxu2 %v3509_v26 }
 0x14c   :  { %v1067_v37 = vadd.f32 %v1066_v43, %v1053_v44  ;;  %v1080_v50 = vpop.f32.mrf.mxu3  ;;  %v3617_v44 = vor.u32 %v4085_v39, %v3616_v38  ;;  %v4095_v39 = vld [vmem:[#allocation7 + $0x384] sm:$0xf] }
 0x14e   :  { %v4487_v54 = vadd.f32 %v1080_v50, %v1067_v37  ;;  %v3337_v50 = vor.u32 %v4014_v36, %v3336_v34  ;;  %2122 = vmatpush.bf16.msrb.mxu3 %v3617_v44  ;;  %v3464_v34 = vld [vmem:[#allocation7 + $0x1e8] sm:$0xf] }
 0x14f   :  { %v1094_v57 = vpop.f32.mrf.mxu0 }
 0x150   :  { %v1255_v62 = vmul.f32 0.5, %v4487_v54  ;;  %v4173_v2 = vpop.eup %4172  ;;  %v1108_v18 = vpop.f32.mrf.mxu1  ;;  %v1095_v14 = vadd.f32 %v1094_v57, %v380_v8  ;;  %v4051_v8 = vld [vmem:[#allocation7 + $0x224] sm:$0xf] }
 0x151   :  { %v1267_v17 = vadd.f32 1.0, %v4173_v2  ;;  %v3493_v43 = vor.u32 %v4051_v8, %v3490_v45  ;;  %v4047_v57 = vld [vmem:[#allocation7 + $0x204] sm:$0xf] }
 0x152   :  { %4174 = vtanh.f32 %v1255_v62  ;;  %v1109_v35 = vadd.f32 %v1108_v18, %v1095_v14  ;;  %2123 = vmatpush.bf16.msrb.mxu3 %v3601_v56  ;;  %v3288_v18 = vld [vmem:[#allocation7 + $0x88] sm:$0xf]  ;;  %v4002_v14 = vld [vmem:[#allocation7 + $0x94] sm:$0xf0] }
 0x153   :  { %v1120_v6 = vpop.f32.mrf.mxu2  ;;  %v1275_v30 = vmul.f32 0.5, %v1267_v17  ;;  %2164 = vmatpush.bf16.msra.mxu2 %v3493_v43  ;;  %v3305_v17 = vor.u32 %v4006_v4, %v3304_v1  ;;  %v3224_v4 = vld [vmem:[#allocation7 + $0x8] sm:$0xf] }
 0x154   :  { %v1121_v11 = vadd.f32 %v1120_v6, %v1107_v3  ;;  %v1134_v12 = vpop.f32.mrf.mxu3  ;;  %v3698_v6 = vld [vmem:[#allocation7 + $0x3d0] sm:$0xf0] }
 0x155   :  { %v1283_v46 = vmul.f32 %v1275_v30, %v4483_v27  ;;  %v3701_v10 = vor.u32 %v4103_v5, %v3698_v6  ;;  %v3272_v30 = vld [vmem:[#allocation7 + $0x68] sm:$0xf]  ;;  %v3986_v5 = vld [vmem:[#allocation7 + $0x14] sm:$0xf0] }
 0x156   :  { %v4490_v19 = vadd.f32 %v1134_v12, %v1121_v11  ;;  %2172 = vmatpush.bf16.msra.mxu3 %v3717_v61  ;;  %v3634_v61 = vld [vmem:[#allocation7 + $0x350] sm:$0xf0]  ;;  %v3416_v6 = vld [vmem:[#allocation7 + $0x188] sm:$0xf] }
 0x157   :  { %v1148_v33 = vpop.f32.mrf.mxu0 }
 0x158   :  { %v4175_v24 = vpop.eup %4174  ;;  %v1252_v25 = vmul.f32 0.5, %v4490_v19  ;;  %v1149_v49 = vadd.f32 %v1148_v33, %v381_v32  ;;  %v1162_v55 = vpop.f32.mrf.mxu1  ;;  %v3998_v33 = vld [vmem:[#allocation7 + $0x74] sm:$0xf0] }
 0x159   :  { %v1271_v31 = vadd.f32 1.0, %v4175_v24  ;;  %v3273_v43 = vor.u32 %v3998_v33, %v3272_v30  ;;  %v3602_v33 = vld [vmem:[#allocation7 + $0x310] sm:$0xf0] }
 0x15a   :  { %4176 = vtanh.f32 %v1252_v25  ;;  %v1163_v63 = vadd.f32 %v1162_v55, %v1149_v49  ;;  %2173 = vmatpush.bf16.msra.mxu3 %v3701_v10  ;;  %v3448_v49 = vld [vmem:[#allocation7 + $0x1c8] sm:$0xf]  ;;  %v3618_v10 = vld [vmem:[#allocation7 + $0x330] sm:$0xf0] }
 0x15b   :  { %v1279_v40 = vmul.f32 0.5, %v1271_v31  ;;  %v1122_v28 = vpop.f32.mrf.mxu2 }
 0x15c   :  { %v1123_v29 = vadd.f32 %v1122_v28, %v1109_v35  ;;  %v1136_v16 = vpop.f32.mrf.mxu3  ;;  %v4046_v35 = vld [vmem:[#allocation7 + $0x1f4] sm:$0xf0] }
 0x15d   :  { %v1287_v47 = vmul.f32 %v1279_v40, %v4487_v54  ;;  %v3477_v54 = vor.u32 %v4047_v57, %v3474_v58  ;;  %v3666_v40 = vld [vmem:[#allocation7 + $0x390] sm:$0xf0]  ;;  %v3449_v57 = vor.u32 %v4042_v41, %v3448_v49  ;;  %v3240_v58 = vld [vmem:[#allocation7 + $0x28] sm:$0xf] }
 0x15e   :  { %v4496_v37 = vadd.f32 %v1136_v16, %v1123_v29  ;;  %2174 = vmatpush.bf16.msra.mxu3 %v3685_v23  ;;  %v3669_v44 = vor.u32 %v4095_v39, %v3666_v40  ;;  %v4030_v23 = vld [vmem:[#allocation7 + $0x174] sm:$0xf0] }
 0x15f   :  { %v4498_v53 = vpack.c.bf16 %v1287_v47, %v1283_v46  ;;  %v1150_v2 = vpop.f32.mrf.mxu0  ;;  %2165 = vmatpush.bf16.msra.mxu2 %v3477_v54  ;;  %v3465_v46 = vor.u32 %v4046_v35, %v3464_v34  ;;  %v3256_v47 = vld [vmem:[#allocation7 + $0x48] sm:$0xf]  ;;  %v4038_v54 = vld [vmem:[#allocation7 + $0x1b4] sm:$0xf0]  ;;  %v4008_v35 = vld [vmem:[#allocation7 + $0xcc] sm:$0xf] }
 0x160   :  { %v1256_v27 = vmul.f32 0.5, %v4496_v37  ;;  %v4177_v62 = vpop.eup %4176  ;;  %v1151_v12 = vadd.f32 %v1150_v2, %v381_v32  ;;  %v1164_v26 = vpop.f32.mrf.mxu1  ;;  %v3289_v32 = vor.u32 %v4002_v14, %v3288_v18  ;;  %v3257_v56 = vor.u32 %v3994_v48, %v3256_v47  ;;  %v3576_v47 = vld [vmem:[#allocation7 + $0x2c8] sm:$0xf]  ;;  %v4074_v48 = vld [vmem:[#allocation7 + $0x2d4] sm:$0xf0] }
 0x161   :  { %2082 = vmatmul.bf16.vlgmr.msrb.gmra.mxu0 %v4498_v53  ;;  %v1268_v11 = vadd.f32 1.0, %v4177_v62  ;;  %v3637_v62 = vor.u32 %v4087_v60, %v3634_v61  ;;  %v3241_v2 = vor.u32 %v3990_v59, %v3240_v58  ;;  %v3368_v58 = vld [vmem:[#allocation7 + $0x128] sm:$0xf]  ;;  %v4022_v59 = vld [vmem:[#allocation7 + $0x134] sm:$0xf0] }
 0x162   :  { %4178 = vtanh.f32 %v1256_v27  ;;  %2186 = vmatpush.bf16.msrb.mxu0 %v3337_v50  ;;  %v1165_v31 = vadd.f32 %v1164_v26, %v1151_v12  ;;  %2175 = vmatpush.bf16.msra.mxu3 %v3669_v44  ;;  %v3432_v27 = vld [vmem:[#allocation7 + $0x1a8] sm:$0xf]  ;;  %v4012_v12 = vld [vmem:[#allocation7 + $0xec] sm:$0xf]  ;;  %v3290_v61 = vld [vmem:[#allocation7 + $0x98] sm:$0xf0] }
 0x163   :  { %v1176_v3 = vpop.f32.mrf.mxu2  ;;  %v1276_v24 = vmul.f32 0.5, %v1268_v11  ;;  %v4000_v60 = vld [vmem:[#allocation7 + $0x8c] sm:$0xf] }
 0x164   :  { %v1177_v7 = vadd.f32 %v1176_v3, %v1163_v63  ;;  %v1190_v9 = vpop.f32.mrf.mxu3  ;;  %v3433_v3 = vor.u32 %v4038_v54, %v3432_v27  ;;  %v3560_v27 = vld [vmem:[#allocation7 + $0x2a8] sm:$0xf]  ;;  %v4070_v54 = vld [vmem:[#allocation7 + $0x2b4] sm:$0xf0] }
 0x165   :  { %v1284_v8 = vmul.f32 %v1276_v24, %v4490_v19  ;;  %v3653_v19 = vor.u32 %v4091_v51, %v3650_v52  ;;  %v3592_v24 = vld [vmem:[#allocation7 + $0x2e8] sm:$0xf]  ;;  %v4004_v51 = vld [vmem:[#allocation7 + $0xac] sm:$0xf] }
 0x166   :  { %v4502_v13 = vadd.f32 %v1190_v9, %v1177_v7  ;;  %2187 = vmatpush.bf16.msrb.mxu0 %v3321_v0  ;;  %v382_v0 = vperm.slane %v4480_v42, 3  ;;  %v4034_v7 = vld [vmem:[#allocation7 + $0x194] sm:$0xf0]  ;;  %v4083_v9 = vld [vmem:[#allocation7 + $0x324] sm:$0xf]  ;;  %v3561_v42 = vor.u32 %v4070_v54, %v3560_v27 }
 0x167   :  { %2176 = vmatpush.bf16.msra.mxu3 %v3653_v19  ;;  %v3621_v18 = vor.u32 %v4083_v9, %v3618_v10  ;;  %v3577_v19 = vor.u32 %v4074_v48, %v3576_v47  ;;  %v3996_v9 = vld [vmem:[#allocation7 + $0x6c] sm:$0xf]  ;;  %v3274_v10 = vld [vmem:[#allocation7 + $0x78] sm:$0xf0]  ;;  %v3496_v47 = vld [vmem:[#allocation7 + $0x228] sm:$0xf] }
 0x168   :  { %v4179_v21 = vpop.eup %4178  ;;  %v1253_v22 = vmul.f32 0.5, %v4502_v13  ;;  %v3720_v27 = vld [vmem:[#allocation7 + $0x3e8] sm:$0xf] }
 0x169   :  { %v1272_v25 = vadd.f32 1.0, %v4179_v21  ;;  %v3225_v21 = vor.u32 %v3986_v5, %v3224_v4  ;;  %v4018_v4 = vld [vmem:[#allocation7 + $0x114] sm:$0xf0]  ;;  %v3544_v5 = vld [vmem:[#allocation7 + $0x288] sm:$0xf] }
 0x16a   :  { %2188 = vmatpush.bf16.msrb.mxu0 %v3305_v17  ;;  %4180 = vtanh.f32 %v1253_v22  ;;  %v3338_v17 = vld [vmem:[#allocation7 + $0xf8] sm:$0xf0]  ;;  %v3417_v22 = vor.u32 %v4034_v7, %v3416_v6  ;;  %v4066_v7 = vld [vmem:[#allocation7 + $0x294] sm:$0xf0] }
 0x16b   :  { %v1280_v36 = vmul.f32 0.5, %v1272_v25  ;;  %v1178_v38 = vpop.f32.mrf.mxu2  ;;  %2177 = vmatpush.bf16.msra.mxu3 %v3637_v62  ;;  %v4078_v25 = vld [vmem:[#allocation7 + $0x2f4] sm:$0xf0] }
 0x16c   :  { %v1179_v28 = vadd.f32 %v1178_v38, %v1165_v31  ;;  %v1192_v29 = vpop.f32.mrf.mxu3  ;;  %v3341_v31 = vor.u32 %v4012_v12, %v3338_v17  ;;  %v3593_v44 = vor.u32 %v4078_v25, %v3592_v24  ;;  %v4044_v12 = vld [vmem:[#allocation7 + $0x1ec] sm:$0xf]  ;;  %v3466_v17 = vld [vmem:[#allocation7 + $0x1f8] sm:$0xf0]  ;;  %v4062_v24 = vld [vmem:[#allocation7 + $0x274] sm:$0xf0] }
 0x16d   :  { %v1288_v45 = vmul.f32 %v1280_v36, %v4496_v37  ;;  %v3322_v36 = vld [vmem:[#allocation7 + $0xd8] sm:$0xf0]  ;;  %v3992_v25 = vld [vmem:[#allocation7 + $0x4c] sm:$0xf] }
 0x16e   :  { %v4507_v16 = vadd.f32 %v1192_v29, %v1179_v28  ;;  %2189 = vmatpush.bf16.msrb.mxu0 %v3289_v32  ;;  %v4079_v32 = vld [vmem:[#allocation7 + $0x304] sm:$0xf]  ;;  %v3401_v28 = vor.u32 %v4030_v23, %v3400_v20  ;;  %v3545_v20 = vor.u32 %v4066_v7, %v3544_v5  ;;  %v3469_v23 = vor.u32 %v4044_v12, %v3466_v17  ;;  %v3386_v12 = vld [vmem:[#allocation7 + $0x158] sm:$0xf0]  ;;  %v4072_v17 = vld [vmem:[#allocation7 + $0x2cc] sm:$0xf] }
 0x16f   :  { %v4509_v50 = vpack.c.bf16 %v1288_v45, %v1284_v8  ;;  %2178 = vmatpush.bf16.msra.mxu3 %v3621_v18  ;;  %v3605_v38 = vor.u32 %v4079_v32, %v3602_v33  ;;  %v3384_v8 = vld [vmem:[#allocation7 + $0x148] sm:$0xf]  ;;  %v3450_v32 = vld [vmem:[#allocation7 + $0x1d8] sm:$0xf0] }
 0x170   :  { %v1257_v55 = vmul.f32 0.5, %v4507_v16  ;;  %v4181_v37 = vpop.eup %4180 }
 0x171   :  { %2096 = vmatmul.bf16.vlgmr.msrb.gmra.mxu1 %v4509_v50  ;;  %2138 = vmatmul.bf16.vlgmr.msra.gmra.mxu0 %v4498_v53  ;;  %v1269_v63 = vadd.f32 1.0, %v4181_v37 }
 0x172   :  { %4182 = vtanh.f32 %v1257_v55  ;;  %2190 = vmatpush.bf16.msrb.mxu0 %v3273_v43  ;;  %2200 = vmatpush.bf16.msrb.mxu1 %v3465_v46  ;;  %v3325_v43 = vor.u32 %v4008_v35, %v3322_v36  ;;  %v4026_v46 = vld [vmem:[#allocation7 + $0x154] sm:$0xf0]  ;;  %v3512_v36 = vld [vmem:[#allocation7 + $0x248] sm:$0xf] }
 0x173   :  { %v1277_v14 = vmul.f32 0.5, %v1269_v63  ;;  %2179 = vmatpush.bf16.msra.mxu3 %v3605_v38  ;;  %v3385_v55 = vor.u32 %v4026_v46, %v3384_v8  ;;  %v3434_v8 = vld [vmem:[#allocation7 + $0x1b8] sm:$0xf0] }
 0x175   :  { %v1285_v39 = vmul.f32 %v1277_v14, %v4502_v13  ;;  %v3306_v13 = vld [vmem:[#allocation7 + $0xb8] sm:$0xf0] }
 0x176   :  { %2191 = vmatpush.bf16.msrb.mxu0 %v3257_v56  ;;  %2201 = vmatpush.bf16.msrb.mxu1 %v3449_v57  ;;  %v3309_v57 = vor.u32 %v4004_v51, %v3306_v13  ;;  %v3226_v51 = vld [vmem:[#allocation7 + $0x18] sm:$0xf0] }
 0x177   :  { %v1204_v1 = vpop.f32.mrf.mxu0 }
 0x178   :  { %v4183_v11 = vpop.eup %4182  ;;  %v1205_v30 = vadd.f32 %v1204_v1, %v382_v0  ;;  %v1218_v34 = vpop.f32.mrf.mxu1  ;;  %v3369_v1 = vor.u32 %v4022_v59, %v3368_v58  ;;  %v3480_v58 = vld [vmem:[#allocation7 + $0x208] sm:$0xf]  ;;  %v4050_v59 = vld [vmem:[#allocation7 + $0x214] sm:$0xf0] }
 0x179   :  { %v1273_v15 = vadd.f32 1.0, %v4183_v11 }
 0x17a   :  { %2192 = vmatpush.bf16.msrb.mxu0 %v3241_v2  ;;  %2202 = vmatpush.bf16.msrb.mxu1 %v3433_v3  ;;  %v1219_v29 = vadd.f32 %v1218_v34, %v1205_v30  ;;  %v3352_v3 = vld [vmem:[#allocation7 + $0x108] sm:$0xf] }
 0x17b   :  { %v1281_v26 = vmul.f32 0.5, %v1273_v15  ;;  %v3353_v14 = vor.u32 %v4018_v4, %v3352_v3  ;;  %v3481_v3 = vor.u32 %v4050_v59, %v3480_v58  ;;  %v3608_v58 = vld [vmem:[#allocation7 + $0x308] sm:$0xf]  ;;  %v4082_v59 = vld [vmem:[#allocation7 + $0x314] sm:$0xf0] }
 0x17d   :  { %v1289_v40 = vmul.f32 %v1281_v26, %v4507_v16  ;;  %v3258_v26 = vld [vmem:[#allocation7 + $0x58] sm:$0xf0] }
 0x17e   :  { %2193 = vmatpush.bf16.msrb.mxu0 %v3225_v21  ;;  %2203 = vmatpush.bf16.msrb.mxu1 %v3417_v22  ;;  %v3277_v21 = vor.u32 %v3996_v9, %v3274_v10  ;;  %v3528_v22 = vld [vmem:[#allocation7 + $0x268] sm:$0xf]  ;;  %v3261_v35 = vor.u32 %v3992_v25, %v3258_v26  ;;  %v4106_v10 = vld [vmem:[#allocation7 + $0x3d4] sm:$0xf0]  ;;  %v3562_v25 = vld [vmem:[#allocation7 + $0x2b8] sm:$0xf0] }
 0x17f   :  { %v4519_v45 = vpack.c.bf16 %v1289_v40, %v1285_v39  ;;  %v1206_v49 = vpop.f32.mrf.mxu0  ;;  %v3529_v34 = vor.u32 %v4062_v24, %v3528_v22  ;;  %v4058_v39 = vld [vmem:[#allocation7 + $0x254] sm:$0xf0]  ;;  %v3988_v40 = vld [vmem:[#allocation7 + $0x2c] sm:$0xf]  ;;  %v3704_v9 = vld [vmem:[#allocation7 + $0x3c8] sm:$0xf] }
 0x180   :  { %v1207_v37 = vadd.f32 %v1206_v49, %v382_v0  ;;  %v1220_v63 = vpop.f32.mrf.mxu1  ;;  %v3293_v0 = vor.u32 %v4000_v60, %v3290_v61  ;;  %v4054_v49 = vld [vmem:[#allocation7 + $0x234] sm:$0xf0]  ;;  %v4020_v22 = vld [vmem:[#allocation7 + $0x12c] sm:$0xf] }
 0x181   :  { %2110 = vmatmul.bf16.vlgmr.msrb.gmra.mxu2 %v4519_v45  ;;  %2152 = vmatmul.bf16.vlgmr.msra.gmra.mxu1 %v4509_v50  ;;  %v4110_v61 = vld [vmem:[#allocation7 + $0x3f4] sm:$0xf0]  ;;  %v4068_v24 = vld [vmem:[#allocation7 + $0x2ac] sm:$0xf] }
 0x182   :  { %2242 = vmatpush.bf16.msra.mxu0 %v3341_v31  ;;  %2204 = vmatpush.bf16.msrb.mxu1 %v3401_v28  ;;  %v1221_v2 = vadd.f32 %v1220_v63, %v1207_v37  ;;  %v4040_v31 = vld [vmem:[#allocation7 + $0x1cc] sm:$0xf]  ;;  %v3242_v28 = vld [vmem:[#allocation7 + $0x38] sm:$0xf0]  ;;  %v3497_v37 = vor.u32 %v4054_v49, %v3496_v47  ;;  %v3721_v4 = vor.u32 %v4110_v61, %v3720_v27  ;;  %v3640_v47 = vld [vmem:[#allocation7 + $0x348] sm:$0xf] }
 0x183   :  { %v1232_v41 = vpop.f32.mrf.mxu2  ;;  %2194 = vmatmul.bf16.vlgmr.msrb.gmra.mxu0 %v4498_v53  ;;  %2214 = vmatpush.bf16.msrb.mxu2 %v3593_v44  ;;  %v3453_v38 = vor.u32 %v4040_v31, %v3450_v32  ;;  %v4036_v44 = vld [vmem:[#allocation7 + $0x1ac] sm:$0xf]  ;;  %v3245_v46 = vor.u32 %v3988_v40, %v3242_v28  ;;  %v3402_v63 = vld [vmem:[#allocation7 + $0x178] sm:$0xf0]  ;;  %v3672_v31 = vld [vmem:[#allocation7 + $0x388] sm:$0xf] }
 0x184   :  { %v1233_v52 = vadd.f32 %v1232_v41, %v1219_v29  ;;  %v1246_v16 = vpop.f32.mrf.mxu3  ;;  %v3437_v48 = vor.u32 %v4036_v44, %v3434_v8  ;;  %v3984_v41 = vld [vmem:[#allocation7 + $0xc] sm:$0xf]  ;;  %v4098_v32 = vld [vmem:[#allocation7 + $0x394] sm:$0xf0]  ;;  %v3656_v28 = vld [vmem:[#allocation7 + $0x368] sm:$0xf] }
 0x185   :  { %v4094_v44 = vld [vmem:[#allocation7 + $0x374] sm:$0xf0]  ;;  %v4060_v8 = vld [vmem:[#allocation7 + $0x26c] sm:$0xf]  ;;  %v3722_v61 = vld [vmem:[#allocation7 + $0x3f8] sm:$0xf0] }
 0x186   :  { %v4526_v56 = vadd.f32 %v1246_v16, %v1233_v52  ;;  %2243 = vmatpush.bf16.msra.mxu0 %v3325_v43  ;;  %2205 = vmatpush.bf16.msrb.mxu1 %v3385_v55  ;;  %v3513_v43 = vor.u32 %v4058_v39, %v3512_v36  ;;  %v4032_v52 = vld [vmem:[#allocation7 + $0x18c] sm:$0xf]  ;;  %v3418_v16 = vld [vmem:[#allocation7 + $0x198] sm:$0xf0] }
 0x187   :  { %2215 = vmatpush.bf16.msrb.mxu2 %v3577_v19  ;;  %v3421_v60 = vor.u32 %v4032_v52, %v3418_v16  ;;  %v3546_v36 = vld [vmem:[#allocation7 + $0x298] sm:$0xf0]  ;;  %v4056_v49 = vld [vmem:[#allocation7 + $0x24c] sm:$0xf]  ;;  %v3624_v52 = vld [vmem:[#allocation7 + $0x328] sm:$0xf] }
 0x188   :  { %v1254_v62 = vmul.f32 0.5, %v4526_v56  ;;  %v4086_v16 = vld [vmem:[#allocation7 + $0x334] sm:$0xf0]  ;;  %v4048_v27 = vld [vmem:[#allocation7 + $0x20c] sm:$0xf] }
 0x18a   :  { %2244 = vmatpush.bf16.msra.mxu0 %v3309_v57  ;;  %4184 = vtanh.f32 %v1254_v62  ;;  %2206 = vmatpush.bf16.msrb.mxu1 %v3369_v1  ;;  %v3229_v57 = vor.u32 %v3984_v41, %v3226_v51  ;;  %v4028_v62 = vld [vmem:[#allocation7 + $0x16c] sm:$0xf]  ;;  %v3514_v41 = vld [vmem:[#allocation7 + $0x258] sm:$0xf0] }
 0x18b   :  { %v1234_v6 = vpop.f32.mrf.mxu2  ;;  %2216 = vmatpush.bf16.msrb.mxu2 %v3561_v42  ;;  %v4076_v1 = vld [vmem:[#allocation7 + $0x2ec] sm:$0xf] }
 0x18c   :  { %v1235_v11 = vadd.f32 %v1234_v6, %v1221_v2  ;;  %v1248_v18 = vpop.f32.mrf.mxu3  ;;  %v3594_v2 = vld [vmem:[#allocation7 + $0x2f8] sm:$0xf0]  ;;  %v3405_v6 = vor.u32 %v4028_v62, %v3402_v63  ;;  %v3609_v62 = vor.u32 %v4082_v59, %v3608_v58 }
 0x18d   :  { %v3597_v7 = vor.u32 %v4076_v1, %v3594_v2  ;;  %v4104_v1 = vld [vmem:[#allocation7 + $0x3cc] sm:$0xf]  ;;  %v3706_v2 = vld [vmem:[#allocation7 + $0x3d8] sm:$0xf0] }
 0x18e   :  { %v1249_v15 = vadd.f32 %v1248_v18, %v1235_v11  ;;  %2245 = vmatpush.bf16.msra.mxu0 %v3293_v0  ;;  %2207 = vmatpush.bf16.msrb.mxu1 %v3353_v14  ;;  %v4024_v11 = vld [vmem:[#allocation7 + $0x14c] sm:$0xf]  ;;  %v3578_v18 = vld [vmem:[#allocation7 + $0x2d8] sm:$0xf0] }
 0x18f   :  { %2217 = vmatpush.bf16.msrb.mxu2 %v3545_v20  ;;  %v3389_v14 = vor.u32 %v4024_v11, %v3386_v12  ;;  %v3688_v20 = vld [vmem:[#allocation7 + $0x3a8] sm:$0xf]  ;;  %v3658_v11 = vld [vmem:[#allocation7 + $0x378] sm:$0xf0] }
 0x190   :  { %v1258_v30 = vmul.f32 0.5, %v1249_v15  ;;  %v4185_v33 = vpop.eup %4184  ;;  %v4132_v58 = vld [vmem:[#allocation10 + $0xa8] sm:$0xff] }
 0x191   :  { %2166 = vmatmul.bf16.vlgmr.msra.gmra.mxu2 %v4519_v45  ;;  %2208 = vmatmul.bf16.vlgmr.msrb.gmra.mxu1 %v4509_v50  ;;  %v1270_v29 = vadd.f32 1.0, %v4185_v33  ;;  %v4016_v33 = vld [vmem:[#allocation7 + $0x10c] sm:$0xf] }
 0x192   :  { %4186 = vtanh.f32 %v1258_v30  ;;  %2246 = vmatpush.bf16.msra.mxu0 %v3277_v21  ;;  %2256 = vmatpush.bf16.msra.mxu1 %v3469_v23  ;;  %v4102_v21 = vld [vmem:[#allocation7 + $0x3b4] sm:$0xf0]  ;;  %v3370_v23 = vld [vmem:[#allocation7 + $0x138] sm:$0xf0]  ;;  %v3565_v30 = vor.u32 %v4068_v24, %v3562_v25  ;;  %v4117_v24 = vld [vmem:[#allocation10 + $0x30] sm:$0xff] }
 0x193   :  { %2218 = vmatpush.bf16.msrb.mxu2 %v3529_v34  ;;  %v1278_v55 = vmul.f32 0.5, %v1270_v29  ;;  %v3689_v26 = vor.u32 %v4102_v21, %v3688_v20  ;;  %v3354_v34 = vld [vmem:[#allocation7 + $0x118] sm:$0xf0]  ;;  %v4080_v21 = vld [vmem:[#allocation7 + $0x30c] sm:$0xf] }
 0x194   :  { %v3357_v39 = vor.u32 %v4016_v33, %v3354_v34  ;;  %v3530_v29 = vld [vmem:[#allocation7 + $0x278] sm:$0xf0]  ;;  %v4113_v33 = vld [vmem:[#allocation10 + $0x10] sm:$0xff] }
 0x195   :  { %v1286_v42 = vmul.f32 %v1278_v55, %v4526_v56  ;;  %v3705_v56 = vor.u32 %v4106_v10, %v3704_v9  ;;  %v4052_v55 = vld [vmem:[#allocation7 + $0x22c] sm:$0xf]  ;;  %v4116_v25 = vld [vmem:[#allocation10 + $0x28] sm:$0xff]  ;;  %v4125_v34 = vld [vmem:[#allocation10 + $0x70] sm:$0xff] }
 0x196   :  { %2247 = vmatpush.bf16.msra.mxu0 %v3261_v35  ;;  %2257 = vmatpush.bf16.msra.mxu1 %v3453_v38  ;;  %v4064_v35 = vld [vmem:[#allocation7 + $0x28c] sm:$0xf]  ;;  %v3673_v38 = vor.u32 %v4098_v32, %v3672_v31 }
 0x197   :  { %2219 = vmatpush.bf16.msrb.mxu2 %v3513_v43  ;;  %v3549_v40 = vor.u32 %v4064_v35, %v3546_v36  ;;  %v3657_v43 = vor.u32 %v4094_v44, %v3656_v28  ;;  %v4092_v10 = vld [vmem:[#allocation7 + $0x36c] sm:$0xf]  ;;  %v4112_v36 = vld [vmem:[#allocation10 + $0x8] sm:$0xff]  ;;  %v4111_v28 = vld [vmem:[#allocation10] sm:$0xff] }
 0x198   :  { %v4187_v13 = vpop.eup %4186  ;;  %v3661_v12 = vor.u32 %v4092_v10, %v3658_v11  ;;  %v4123_v44 = vld [vmem:[#allocation10 + $0x60] sm:$0xff] }
 0x199   :  { %v1274_v19 = vadd.f32 1.0, %v4187_v13  ;;  %v3517_v13 = vor.u32 %v4056_v49, %v3514_v41 }
 0x19a   :  { %2248 = vmatpush.bf16.msra.mxu0 %v3245_v46  ;;  %2258 = vmatpush.bf16.msra.mxu1 %v3437_v48  ;;  %v3533_v46 = vor.u32 %v4060_v8, %v3530_v29  ;;  %v4090_v48 = vld [vmem:[#allocation7 + $0x354] sm:$0xf0] }
 0x19b   :  { %v1282_v54 = vmul.f32 0.5, %v1274_v19  ;;  %2220 = vmatpush.bf16.msrb.mxu2 %v3497_v37  ;;  %v3641_v51 = vor.u32 %v4090_v48, %v3640_v47  ;;  %v3498_v19 = vld [vmem:[#allocation7 + $0x238] sm:$0xf0]  ;;  %v3625_v37 = vor.u32 %v4086_v16, %v3624_v52  ;;  %v4134_v47 = vld [vmem:[#allocation10 + $0xb8] sm:$0xff] }
 0x19d   :  { %v1290_v0 = vmul.f32 %v1282_v54, %v1249_v15  ;;  %v3581_v15 = vor.u32 %v4072_v17, %v3578_v18  ;;  %v3482_v54 = vld [vmem:[#allocation7 + $0x218] sm:$0xf0]  ;;  %v4088_v17 = vld [vmem:[#allocation7 + $0x34c] sm:$0xf] }
 0x19e   :  { %2249 = vmatpush.bf16.msra.mxu0 %v3229_v57  ;;  %2259 = vmatpush.bf16.msra.mxu1 %v3421_v60  ;;  %v3501_v57 = vor.u32 %v4052_v55, %v3498_v19  ;;  %v4108_v60 = vld [vmem:[#allocation7 + $0x3ec] sm:$0xf]  ;;  %v3642_v18 = vld [vmem:[#allocation7 + $0x358] sm:$0xf0] }
 0x19f   :  { %v4532_v5 = vpack.c.bf16 %v1290_v0, %v1286_v42  ;;  %2221 = vmatpush.bf16.msrb.mxu2 %v3481_v3  ;;  %v3725_v63 = vor.u32 %v4108_v60, %v3722_v61  ;;  %v3709_v42 = vor.u32 %v4104_v1, %v3706_v2  ;;  %v4100_v0 = vld [vmem:[#allocation7 + $0x3ac] sm:$0xf]  ;;  %v3690_v3 = vld [vmem:[#allocation7 + $0x3b8] sm:$0xf0] }
 0x1a1   :  { %2124 = vmatmul.bf16.vlgmr.msrb.gmra.mxu3 %v4532_v5  ;;  %2250 = vmatmul.bf16.vlgmr.msra.gmra.mxu0 %v4498_v53  ;;  %v3373_v53 = vor.u32 %v4020_v22, %v3370_v23  ;;  %v4118_v23 = vld [vmem:[#allocation10 + $0x38] sm:$0xff] }
 0x1a2   :  { %2228 = vmatpush.bf16.msrb.mxu3 %v3721_v4  ;;  %2260 = vmatpush.bf16.msra.mxu1 %v3405_v6  ;;  %v3693_v4 = vor.u32 %v4100_v0, %v3690_v3  ;;  %v4096_v6 = vld [vmem:[#allocation7 + $0x38c] sm:$0xf] }
 0x1a3   :  { %2270 = vmatpush.bf16.msra.mxu2 %v3597_v7  ;;  %v3674_v7 = vld [vmem:[#allocation7 + $0x398] sm:$0xf0]  ;;  %2602 = vmatpush.bf16.msrb.mxu0 %v4118_v23  ;;  %v4130_v0 = vld [vmem:[#allocation10 + $0x98] sm:$0xff] }
 0x1a4   :  { %2222 = vmatmul.bf16.vlgmr.msrb.gmra.mxu2 %v4519_v45  ;;  %v3677_v9 = vor.u32 %v4096_v6, %v3674_v7 }
 0x1a6   :  { %2229 = vmatpush.bf16.msrb.mxu3 %v3705_v56  ;;  %2261 = vmatpush.bf16.msra.mxu1 %v3389_v14  ;;  %v3645_v56 = vor.u32 %v4088_v17, %v3642_v18  ;;  %v4084_v14 = vld [vmem:[#allocation7 + $0x32c] sm:$0xf] }
 0x1a7   :  { %2271 = vmatpush.bf16.msra.mxu2 %v3581_v15  ;;  %v3626_v15 = vld [vmem:[#allocation7 + $0x338] sm:$0xf0]  ;;  %2603 = vmatpush.bf16.msrb.mxu0 %v4117_v24 }
 0x1a8   :  { %v3629_v20 = vor.u32 %v4084_v14, %v3626_v15 }
 0x1aa   :  { %2230 = vmatpush.bf16.msrb.mxu3 %v3689_v26  ;;  %2262 = vmatpush.bf16.msra.mxu1 %v3373_v53  ;;  %v4115_v26 = vld [vmem:[#allocation10 + $0x20] sm:$0xff]  ;;  %v4114_v53 = vld [vmem:[#allocation10 + $0x18] sm:$0xff] }
 0x1ab   :  { %2272 = vmatpush.bf16.msra.mxu2 %v3565_v30  ;;  %2604 = vmatpush.bf16.msrb.mxu0 %v4116_v25  ;;  %v4126_v30 = vld [vmem:[#allocation10 + $0x78] sm:$0xff] }
 0x1ae   :  { %2231 = vmatpush.bf16.msrb.mxu3 %v3673_v38  ;;  %2263 = vmatpush.bf16.msra.mxu1 %v3357_v39  ;;  %v4124_v38 = vld [vmem:[#allocation10 + $0x68] sm:$0xff] }
 0x1af   :  { %2273 = vmatpush.bf16.msra.mxu2 %v3549_v40  ;;  %2605 = vmatpush.bf16.msrb.mxu0 %v4115_v26 }
 0x1b1   :  { %2180 = vmatmul.bf16.vlgmr.msra.gmra.mxu3 %v4532_v5  ;;  %2264 = vmatmul.bf16.vlgmr.msra.gmra.mxu1 %v4509_v50  ;;  %v3485_v50 = vor.u32 %v4048_v27, %v3482_v54 }
 0x1b2   :  { %2232 = vmatpush.bf16.msrb.mxu3 %v3657_v43  ;;  %2616 = vmatpush.bf16.msrb.mxu1 %v4126_v30 }
 0x1b3   :  { %2274 = vmatpush.bf16.msra.mxu2 %v3533_v46  ;;  %2606 = vmatpush.bf16.msrb.mxu0 %v4114_v53  ;;  %v4122_v46 = vld [vmem:[#allocation10 + $0x58] sm:$0xff] }
 0x1b6   :  { %2233 = vmatpush.bf16.msrb.mxu3 %v3641_v51  ;;  %2617 = vmatpush.bf16.msrb.mxu1 %v4125_v34  ;;  %v4121_v51 = vld [vmem:[#allocation10 + $0x50] sm:$0xff] }
 0x1b7   :  { %2275 = vmatpush.bf16.msra.mxu2 %v3517_v13  ;;  %2607 = vmatpush.bf16.msrb.mxu0 %v4113_v33  ;;  %v4133_v13 = vld [vmem:[#allocation10 + $0xb0] sm:$0xff]  ;;  %v4142_v33 = vld [vmem:[#allocation10 + $0xf8] sm:$0xff] }
 0x1ba   :  { %2234 = vmatpush.bf16.msrb.mxu3 %v3625_v37  ;;  %2618 = vmatpush.bf16.msrb.mxu1 %v4124_v38 }
 0x1bb   :  { %2276 = vmatpush.bf16.msra.mxu2 %v3501_v57  ;;  %2608 = vmatpush.bf16.msrb.mxu0 %v4112_v36  ;;  %v4120_v57 = vld [vmem:[#allocation10 + $0x48] sm:$0xff] }
 0x1be   :  { %2235 = vmatpush.bf16.msrb.mxu3 %v3609_v62  ;;  %2619 = vmatpush.bf16.msrb.mxu1 %v4123_v44  ;;  %v4119_v62 = vld [vmem:[#allocation10 + $0x40] sm:$0xff] }
 0x1bf   :  { %2277 = vmatpush.bf16.msra.mxu2 %v3485_v50  ;;  %2609 = vmatpush.bf16.msrb.mxu0 %v4111_v28  ;;  %v4131_v50 = vld [vmem:[#allocation10 + $0xa0] sm:$0xff] }
 0x1c1   :  { %2236 = vmatmul.bf16.vlgmr.msrb.gmra.mxu3 %v4532_v5 }
 0x1c2   :  { %2284 = vmatpush.bf16.msra.mxu3 %v3725_v63  ;;  %2278 = vmatmul.bf16.vlgmr.msra.gmra.mxu2 %v4519_v45  ;;  %v3610_v45 = vld [vmem:[#allocation7 + $0x318] sm:$0xf0] }
 0x1c3   :  { %v3613_v22 = vor.u32 %v4080_v21, %v3610_v45  ;;  %2620 = vmatpush.bf16.msrb.mxu1 %v4122_v46  ;;  %2630 = vmatpush.bf16.msrb.mxu2 %v4134_v47  ;;  %v4128_v21 = vld [vmem:[#allocation10 + $0x88] sm:$0xff] }
 0x1c4   :  { %v4140_v47 = vld [vmem:[#allocation10 + $0xe8] sm:$0xff] }
 0x1c6   :  { %2285 = vmatpush.bf16.msra.mxu3 %v3709_v42 }
 0x1c7   :  { %2621 = vmatpush.bf16.msrb.mxu1 %v4121_v51  ;;  %2631 = vmatpush.bf16.msrb.mxu2 %v4133_v13 }
 0x1ca   :  { %2286 = vmatpush.bf16.msra.mxu3 %v3693_v4 }
 0x1cb   :  { %2622 = vmatpush.bf16.msrb.mxu1 %v4120_v57  ;;  %2632 = vmatpush.bf16.msrb.mxu2 %v4132_v58 }
 0x1ce   :  { %2287 = vmatpush.bf16.msra.mxu3 %v3677_v9 }
 0x1cf   :  { %2623 = vmatpush.bf16.msrb.mxu1 %v4119_v62  ;;  %2633 = vmatpush.bf16.msrb.mxu2 %v4131_v50 }
 0x1d2   :  { %2288 = vmatpush.bf16.msra.mxu3 %v3661_v12  ;;  %v4129_v12 = vld [vmem:[#allocation10 + $0x90] sm:$0xff] }
 0x1d3   :  { %2634 = vmatpush.bf16.msrb.mxu2 %v4130_v0 }
 0x1d6   :  { %2289 = vmatpush.bf16.msra.mxu3 %v3645_v56 }
 0x1d7   :  { %2635 = vmatpush.bf16.msrb.mxu2 %v4129_v12 }
 0x1da   :  { %2290 = vmatpush.bf16.msra.mxu3 %v3629_v20 }
 0x1db   :  { %2636 = vmatpush.bf16.msrb.mxu2 %v4128_v21 }
 0x1de   :  { %2291 = vmatpush.bf16.msra.mxu3 %v3613_v22  ;;  %v2083_v31 = vpop.f32.mrf.mxu0 }
 0x1e1   :  { %2292 = vmatmul.bf16.vlgmr.msra.gmra.mxu3 %v4532_v5  ;;  %v4542_v5 = vld [vmem:[#allocation8 + $0x2] ss:$4 sm:$0xf] }
 0x1e2   :  { %v1426_v39 = vperm.slane %v4542_v5, 0  ;;  %v1427_v54 = vperm.slane %v4542_v5, 1  ;;  %v1428_v24 = vperm.slane %v4542_v5, 2  ;;  %2644 = vmatpush.bf16.msrb.mxu3 %v4142_v33 }
 0x1e4   :  { %v2084_v29 = vadd.f32 %v2083_v31, %v1426_v39 }
 0x1e6   :  { %v2085_v40 = vpop.f32.mrf.mxu0 }
 0x1e7   :  { %v2086_v55 = vadd.f32 %v2085_v40, %v1426_v39  ;;  %v4141_v40 = vld [vmem:[#allocation10 + $0xf0] sm:$0xff] }
 0x1e8   :  { %2645 = vmatpush.bf16.msrb.mxu3 %v4141_v40 }
 0x1ec   :  { %2646 = vmatpush.bf16.msrb.mxu3 %v4140_v47 }
 0x1ee   :  { %v2097_v32 = vpop.f32.mrf.mxu1  ;;  %v2139_v16 = vpop.f32.mrf.mxu0 }
 0x1ef   :  { %v2098_v48 = vadd.f32 %v2097_v32, %v2084_v29  ;;  %v2140_v1 = vadd.f32 %v2139_v16, %v1427_v54  ;;  %v4127_v32 = vld [vmem:[#allocation10 + $0x80] sm:$0xff] }
 0x1f0   :  { %2637 = vmatpush.bf16.msrb.mxu2 %v4127_v32 }
 0x1f6   :  { %v2099_v8 = vpop.f32.mrf.mxu1  ;;  %v2141_v42 = vpop.f32.mrf.mxu0 }
 0x1f7   :  { %v2100_v59 = vadd.f32 %v2099_v8, %v2086_v55  ;;  %v2142_v56 = vadd.f32 %v2141_v42, %v1427_v54  ;;  %v4136_v42 = vld [vmem:[#allocation10 + $0xc8] sm:$0xff] }
 0x1fe   :  { %v2153_v37 = vpop.f32.mrf.mxu1 }
 0x1ff   :  { %v2154_v4 = vadd.f32 %v2153_v37, %v2140_v1 }
 0x200   :  { %v2195_v22 = vpop.f32.mrf.mxu0 }
 0x201   :  { %v2196_v38 = vadd.f32 %v2195_v22, %v1428_v24 }
 0x204   :  { %v2111_v35 = vpop.f32.mrf.mxu2 }
 0x205   :  { %v2112_v49 = vadd.f32 %v2111_v35, %v2098_v48 }
 0x206   :  { %v2155_v6 = vpop.f32.mrf.mxu1 }
 0x207   :  { %v2156_v45 = vadd.f32 %v2155_v6, %v2142_v56 }
 0x208   :  { %v2197_v29 = vpop.f32.mrf.mxu0 }
 0x209   :  { %v2198_v51 = vadd.f32 %v2197_v29, %v1428_v24  ;;  %v4155_v29 = vld [vmem:[%s4560_s6] ss:$0 sm:$0xff]  ;;  %s4369_s6 = smov [#allocation11]  }
 0x20a   :  { %s2677_s28 = sshll.u32 %s4369_s6, 4  ;;  %s2678_s28 = int_to_ptr.vmem [resolvable:$true] %s2677_s28 }
 0x20c   :  { %v2113_v43 = vpop.f32.mrf.mxu2 }
 0x20d   :  { %v2114_v60 = vadd.f32 %v2113_v43, %v2100_v59 }
 0x20e   :  { %v2209_v26 = vpop.f32.mrf.mxu1 }
 0x20f   :  { %v2210_v44 = vadd.f32 %v2209_v26, %v2196_v38 }
 0x214   :  { %v2167_v27 = vpop.f32.mrf.mxu2 }
 0x215   :  { %v2168_v7 = vadd.f32 %v2167_v27, %v2154_v4  ;;  %v1429_v4 = vperm.slane %v4542_v5, 3 }
 0x21c   :  { %v2169_v9 = vpop.f32.mrf.mxu2 }
 0x21d   :  { %v2170_v25 = vadd.f32 %v2169_v9, %v2156_v45  ;;  %v4135_v9 = vld [vmem:[#allocation10 + $0xc0] sm:$0xff] }
 0x224   :  { %v2125_v41 = vpop.f32.mrf.mxu3 }
 0x225   :  { %v2126_v52 = vadd.f32 %v2125_v41, %v2112_v49  ;;  %v2211_v49 = vpop.f32.mrf.mxu1 }
 0x226   :  { %v2212_v37 = vadd.f32 %v2211_v49, %v2198_v51 }
 0x227   :  { %v2298_v19 = vmul.f32 0.5, %v2126_v52  ;;  %v2223_v35 = vpop.f32.mrf.mxu2 }
 0x228   :  { %v2224_v8 = vadd.f32 %v2223_v35, %v2210_v44 }
 0x229   :  { %4188 = vtanh.f32 %v2298_v19  ;;  %v4139_v19 = vld [vmem:[#allocation10 + $0xe0] sm:$0xff] }
 0x22a   :  { %2647 = vmatpush.bf16.msrb.mxu3 %v4139_v19 }
 0x22c   :  { %v2127_v61 = vpop.f32.mrf.mxu3 }
 0x22d   :  { %v2128_v63 = vadd.f32 %v2127_v61, %v2114_v60  ;;  %v4138_v60 = vld [vmem:[#allocation10 + $0xd8] sm:$0xff] }
 0x22e   :  { %2648 = vmatpush.bf16.msrb.mxu3 %v4138_v60 }
 0x22f   :  { %v2302_v2 = vmul.f32 0.5, %v2128_v63  ;;  %v4189_v3 = vpop.eup %4188 }
 0x230   :  { %v2314_v10 = vadd.f32 1.0, %v4189_v3  ;;  %v2251_v3 = vpop.f32.mrf.mxu0 }
 0x231   :  { %4190 = vtanh.f32 %v2302_v2 }
 0x232   :  { %v2322_v15 = vmul.f32 0.5, %v2314_v10  ;;  %v2265_v10 = vpop.f32.mrf.mxu1 }
 0x234   :  { %v2181_v11 = vpop.f32.mrf.mxu3  ;;  %v2330_v53 = vmul.f32 %v2322_v15, %v2126_v52  ;;  %v2225_v52 = vpop.f32.mrf.mxu2 }
 0x235   :  { %v2182_v17 = vadd.f32 %v2181_v11, %v2168_v7  ;;  %v2226_v58 = vadd.f32 %v2225_v52, %v2212_v37 }
 0x237   :  { %v4191_v18 = vpop.eup %4190  ;;  %v2299_v14 = vmul.f32 0.5, %v2182_v17 }
 0x238   :  { %v2318_v20 = vadd.f32 1.0, %v4191_v18  ;;  %v2253_v21 = vpop.f32.mrf.mxu0 }
 0x239   :  { %4192 = vtanh.f32 %v2299_v14  ;;  %v2254_v24 = vadd.f32 %v2253_v21, %v1429_v4 }
 0x23a   :  { %v2326_v23 = vmul.f32 0.5, %v2318_v20 }
 0x23c   :  { %v2334_v30 = vmul.f32 %v2326_v23, %v2128_v63  ;;  %v2183_v31 = vpop.f32.mrf.mxu3  ;;  %v4137_v63 = vld [vmem:[#allocation10 + $0xd0] sm:$0xff]  ;;  %v2267_v23 = vpop.f32.mrf.mxu1 }
 0x23d   :  { %v2184_v34 = vadd.f32 %v2183_v31, %v2170_v25  ;;  %2649 = vmatpush.bf16.msrb.mxu3 %v4137_v63  ;;  %v2268_v26 = vadd.f32 %v2267_v23, %v2254_v24 }
 0x23e   :  { %v2338_v36 = vpack.c.bf16 %v2334_v30, %v2330_v53 }
 0x23f   :  { %v2303_v39 = vmul.f32 0.5, %v2184_v34  ;;  %v4193_v28 = vpop.eup %4192 }
 0x240   :  { %2610 = vmatmul.bf16.vlgmr.msrb.gmra.mxu0 %v2338_v36  ;;  %v2315_v43 = vadd.f32 1.0, %v4193_v28 }
 0x241   :  { %4194 = vtanh.f32 %v2303_v39  ;;  %2650 = vmatpush.bf16.msrb.mxu3 %v4136_v42 }
 0x242   :  { %v2323_v16 = vmul.f32 0.5, %v2315_v43 }
 0x244   :  { %v2237_v46 = vpop.f32.mrf.mxu3  ;;  %v2331_v59 = vmul.f32 %v2323_v16, %v2182_v17  ;;  %v2252_v17 = vadd.f32 %v2251_v3, %v1429_v4 }
 0x245   :  { %v2238_v48 = vadd.f32 %v2237_v46, %v2224_v8  ;;  %2651 = vmatpush.bf16.msrb.mxu3 %v4135_v9  ;;  %v2279_v12 = vpop.f32.mrf.mxu2 }
 0x246   :  { %v2266_v14 = vadd.f32 %v2265_v10, %v2252_v17 }
 0x247   :  { %v4195_v41 = vpop.eup %4194  ;;  %v2300_v13 = vmul.f32 0.5, %v2238_v48 }
 0x248   :  { %v2319_v55 = vadd.f32 1.0, %v4195_v41  ;;  %v2280_v20 = vadd.f32 %v2279_v12, %v2266_v14 }
 0x249   :  { %4196 = vtanh.f32 %v2300_v13 }
 0x24a   :  { %v2327_v57 = vmul.f32 0.5, %v2319_v55 }
 0x24c   :  { %v2335_v27 = vmul.f32 %v2327_v57, %v2184_v34  ;;  %v2239_v54 = vpop.f32.mrf.mxu3  ;;  %v2658_v57 = vlaneseq }
 0x24d   :  { %v2240_v61 = vadd.f32 %v2239_v54, %v2226_v58  ;;  %v2281_v25 = vpop.f32.mrf.mxu2 }
 0x24e   :  { %v2339_v62 = vpack.c.bf16 %v2335_v27, %v2331_v59  ;;  %v2282_v53 = vadd.f32 %v2281_v25, %v2268_v26  ;;  %v2659_v60 = vand.u32 127, %v2658_v57 }
 0x24f   :  { %v2304_v50 = vmul.f32 0.5, %v2240_v61  ;;  %v4197_v1 = vpop.eup %4196 }
 0x250   :  { %2624 = vmatmul.bf16.vlgmr.msrb.gmra.mxu1 %v2339_v62  ;;  %v2316_v2 = vadd.f32 1.0, %v4197_v1  ;;  %vm2668_vm2 = vcmp.eq.s32.totalorder %v2659_v60, 1 }
 0x251   :  { %4198 = vtanh.f32 %v2304_v50 }
 0x252   :  { %v2324_v6 = vmul.f32 0.5, %v2316_v2 }
 0x254   :  { %v2332_v18 = vmul.f32 %v2324_v6, %v2238_v48 }
 0x257   :  { %v4199_v0 = vpop.eup %4198 }
 0x258   :  { %v2320_v7 = vadd.f32 1.0, %v4199_v0 }
 0x25a   :  { %v2328_v11 = vmul.f32 0.5, %v2320_v7 }
 0x25c   :  { %v2336_v56 = vmul.f32 %v2328_v11, %v2240_v61 }
 0x25e   :  { %v2340_v15 = vpack.c.bf16 %v2336_v56, %v2332_v18 }
 0x260   :  { %2638 = vmatmul.bf16.vlgmr.msrb.gmra.mxu2 %v2340_v15 }
 0x264   :  { %v2293_v45 = vpop.f32.mrf.mxu3 }
 0x265   :  { %v2294_v22 = vadd.f32 %v2293_v45, %v2280_v20 }
 0x267   :  { %v2301_v5 = vmul.f32 0.5, %v2294_v22 }
 0x269   :  { %4200 = vtanh.f32 %v2301_v5 }
 0x26c   :  { %v2295_v30 = vpop.f32.mrf.mxu3 }
 0x26d   :  { %v2296_v31 = vadd.f32 %v2295_v30, %v2282_v53 }
 0x26f   :  { %v2305_v32 = vmul.f32 0.5, %v2296_v31  ;;  %v4201_v33 = vpop.eup %4200 }
 0x270   :  { %v2317_v34 = vadd.f32 1.0, %v4201_v33 }
 0x271   :  { %4202 = vtanh.f32 %v2305_v32 }
 0x272   :  { %v2325_v36 = vmul.f32 0.5, %v2317_v34 }
 0x274   :  { %v2333_v40 = vmul.f32 %v2325_v36, %v2294_v22 }
 0x277   :  { %v4203_v35 = vpop.eup %4202 }
 0x278   :  { %v2321_v38 = vadd.f32 1.0, %v4203_v35 }
 0x27a   :  { %v2329_v39 = vmul.f32 0.5, %v2321_v38 }
 0x27c   :  { %v2337_v28 = vmul.f32 %v2329_v39, %v2296_v31 }
 0x27e   :  { %v2341_v44 = vpack.c.bf16 %v2337_v28, %v2333_v40 }
 0x280   :  { %2652 = vmatmul.bf16.vlgmr.msrb.gmra.mxu3 %v2341_v44 }
 0x2bd   :  { %v2611_v8 = vpop.f32.mrf.mxu0 }
 0x2be   :  { %v2612_v47 = vadd.f32 %v4155_v29, %v2611_v8 }
 0x2c5   :  { %v2613_v41 = vpop.f32.mrf.mxu0 }
 0x2c6   :  { %v2614_v16 = vadd.f32 %v4155_v29, %v2613_v41 }
 0x2cd   :  { %v2625_v43 = vpop.f32.mrf.mxu1 }
 0x2ce   :  { %v2626_v48 = vadd.f32 %v2625_v43, %v2612_v47 }
 0x2d5   :  { %v2627_v52 = vpop.f32.mrf.mxu1 }
 0x2d6   :  { %v2628_v37 = vadd.f32 %v2627_v52, %v2614_v16 }
 0x2e3   :  { %v2639_v46 = vpop.f32.mrf.mxu2 }
 0x2e4   :  { %v2640_v49 = vadd.f32 %v2639_v46, %v2626_v48 }
 0x2eb   :  { %v2641_v19 = vpop.f32.mrf.mxu2 }
 0x2ec   :  { %v2642_v59 = vadd.f32 %v2641_v19, %v2628_v37 }
 0x303   :  { %v2653_v51 = vpop.f32.mrf.mxu3 }
 0x304   :  { %v2654_v13 = vadd.f32 %v2653_v51, %v2640_v49 }
 0x306   :  { %v2660_v55 = vmax.f32 %v2654_v13, -20.0 }
 0x308   :  { %v2662_v58 = vmin.f32 %v2660_v55, 2.0 }
 0x30a   :  { %v2664_v27 = vmul.f32 1.442695, %v2662_v58 }
 0x30b   :  { %v2655_v54 = vpop.f32.mrf.mxu3 }
 0x30c   :  { %4204 = vpow2.f32 %v2664_v27  ;;  %v2656_v61 = vadd.f32 %v2655_v54, %v2642_v59 }
 0x30e   :  { %v2661_v62 = vmax.f32 %v2656_v61, -20.0 }
 0x310   :  { %v2663_v50 = vmin.f32 %v2661_v62, 2.0 }
 0x312   :  { %v4205_v63 = vpop.eup %4204  ;;  %v2666_v1 = vmul.f32 1.442695, %v2663_v50 }
 0x313   :  { %v2669_v2 = vsel %vm2668_vm2, %v4205_v63, %v2654_v13 }
 0x314   :  { %2671 = vst [vmem:[#allocation11] sm:$0xff] %v2669_v2  ;;  %4206 = vpow2.f32 %v2666_v1 }
 0x31a   :  { %v4207_v42 = vpop.eup %4206 }
 0x31b   :  { %v2670_v0 = vsel %vm2668_vm2, %v4207_v42, %v2656_v61 }
 0x31c   :  { %2672 = vst [vmem:[#allocation11 + $0x8] sm:$0xff] %v2670_v0 }
 0x31d   :  { %2685 = dma.vmem_to_hbm [thread:$0]  %s2678_s28, 256, %s2680_s8, [#allocation4], %s4370_s9, %s4370_s9, %s4371_s10  }
 0x31e   :  { %4358 = dma.done.wait [#allocation4], 256  }
 0x31f   :  { %4359 = vsyncadd [#allocation4], 4294967040 }
 0x320   :  { %2690 = vsyncpa [#allocation3], 1 }
 0x321   :  { %2691 = vsyncpa [#allocation6], 1 }
 0x322   :  { %2692 = vsyncpa [#allocation9], 1 }
 0x323   :  { %2693 = vsyncpa [#allocation4], 1 }

</bundles_post_ra>
